<compile_context>
chip_gen: v5e
topology: v5e:2x2
jax: 0.10.0
libtpu: 0.0.40
codegen_flags: <defaults>
</compile_context>

<pallas_src>
import jax
import jax.numpy as jnp
from jax.experimental import pallas as pl
from jax.experimental.pallas import tpu as pltpu


# Tensors smaller than this, or with fewer channels than _MIN_KERNEL_C, are
# routed to XLA's native transpose (strictly faster at that scale and avoids
# the masked lane-sparse store path entirely).
_MIN_KERNEL_BYTES = 1 << 20   # 1 MiB
_MIN_KERNEL_C = 32


def _permute_kernel(x_ref, o_ref):
    # x_ref: (TC, T) VMEM tile of the (N, C, H*W) input view.
    # o_ref: (T, TC) VMEM tile of the (N, H*W, C) output view.
    # Single clean 2D transpose on the XLU; DMA handled by BlockSpec pipeline.
    o_ref[...] = x_ref[...].T


def _vmem_capacity_bytes() -> int:
    try:
        return int(pltpu.get_tpu_info().vmem_capacity_bytes)
    except Exception:
        return 64 << 20   # conservative fallback (v7x per-core VMEM)


def _choose_tiles(n: int, c: int, hw: int, itemsize: int, budget_bytes: int):
    """Pick (TC, T, nc, ns) channel/spatial tiles.

    * TC = C (full extent) unless C >= 512, then TC = 256 (multiple of 128
      keeps stores lane-dense even when the channel axis is tiled).
    * T = largest multiple of 128 (<= 128*floor(HW/128)) whose double-buffered
      in+out footprint 4*TC*T*itemsize fits the VMEM budget; full HW if
      HW < 128 (full-extent block dims are always legal).
    * If the grid would have a single point (one v7x core idles), split the
      spatial (preferred) or channel axis into >= 2 blocks.
    """
    tc = c if c < 512 else 256

    if hw < 128:
        t = hw
    else:
        t_max = 128 * (hw // 128)
        t_budget = budget_bytes // max(1, 4 * tc * itemsize)
        t = min(t_max, max(128, 128 * (t_budget // 128)))

    nc = pl.cdiv(c, tc)
    ns = pl.cdiv(hw, t)

    if n * nc * ns == 1:
        if hw >= 256:
            t = 128 * pl.cdiv(pl.cdiv(hw, 2), 128)
            ns = pl.cdiv(hw, t)
        elif c >= 256:
            tc = 128 * pl.cdiv(pl.cdiv(c, 2), 128)
            nc = pl.cdiv(c, tc)

    return tc, t, nc, ns


def permutei(x: jax.Array) -> jax.Array:
    """NCHW -> NHWC permute (torch ``x.permute(0, 2, 3, 1)``)."""
    N, C, H, W = x.shape
    HW = H * W
    itemsize = jnp.dtype(x.dtype).itemsize
    total_bytes = N * C * HW * itemsize

    # Bypass: tiny tensors / tiny channel counts go straight to XLA.
    if total_bytes < _MIN_KERNEL_BYTES or C < _MIN_KERNEL_C or HW == 0:
        return jnp.transpose(x, (0, 2, 3, 1))

    vmem_cap = _vmem_capacity_bytes()
    budget = vmem_cap // 2                      # ~50% of per-core VMEM
    TC, T, nc, ns = _choose_tiles(N, C, HW, itemsize, budget)

    # Deeper input pipelining only pays when tiles are small (DMA-latency
    # dominated) and there are enough spatial steps to fill the pipe.
    use_triple_buffer = (T <= 256) and (ns >= 3)
    if use_triple_buffer:
        in_spec = pl.BlockSpec((None, TC, T), lambda n, c, s: (n, c, s),
                               pipeline_mode=pl.Buffered(3))
        in_buffers = 3
    else:
        in_spec = pl.BlockSpec((None, TC, T), lambda n, c, s: (n, c, s))
        in_buffers = 2
    out_spec = pl.BlockSpec((None, T, TC), lambda n, c, s: (n, s, c))

    tile_bytes = TC * T * itemsize
    footprint = (in_buffers + 2) * tile_bytes          # in bufs + 2 out bufs
    vmem_limit = int(min(int(0.85 * vmem_cap),
                         max(footprint + (16 << 20), 32 << 20)))

    # Wrapper-side flatten of the contiguous spatial dims (metadata only).
    x2 = x.reshape(N, C, HW)

    out2 = pl.pallas_call(
        _permute_kernel,
        out_shape=jax.ShapeDtypeStruct((N, HW, C), x.dtype),
        grid_spec=pl.GridSpec(
            grid=(N, nc, ns),
            in_specs=[in_spec],
            out_specs=out_spec,
        ),
        compiler_params=pltpu.CompilerParams(
            dimension_semantics=("parallel", "parallel", "parallel"),
            vmem_limit_bytes=vmem_limit,
        ),
        cost_estimate=pl.CostEstimate(
            flops=0,
            transcendentals=0,
            bytes_accessed=2 * total_bytes,
        ),
    )(x2)

    # Wrapper-side un-flatten back to NHWC (metadata only).
    return out2.reshape(N, H, W, C)


if __name__ == "__main__":
    key = jax.random.PRNGKey(0)
    k0, k1, k2, k3, k4 = jax.random.split(key, 5)

    def _check(a):
        out = jax.block_until_ready(permutei(a))
        ref = jnp.transpose(a, (0, 2, 3, 1))
        assert out.shape == ref.shape, (out.shape, ref.shape)
        assert out.dtype == a.dtype, (out.dtype, a.dtype)
        assert bool(jnp.array_equal(out, ref)), "mismatch vs reference permute"

    # 1) Spec shape (tiny, C=4): routed to the XLA-transpose bypass.
    _check(jax.random.normal(k0, (2, 4, 16, 16), dtype=jnp.float32))

    # 2) Kernel path: 128-aligned spatial extent, full-C tile, grid (2,1,1).
    _check(jax.random.normal(k1, (2, 256, 32, 32), dtype=jnp.float32))

    # 3) Kernel path: ragged spatial extent (HW = 3136, not a multiple of 128)
    #    exercising the cdiv grid's partial last block.
    _check(jax.random.normal(k2, (1, 128, 56, 56), dtype=jnp.float32))

    # 4) Kernel path: N=1, HW exact multiple of 128 -> exercises the
    #    >=2-grid-point spatial split (v7x core sharding).
    _check(jax.random.normal(k3, (1, 128, 64, 64), dtype=jnp.float32))

    # 5) Kernel path: sub-32-bit dtype (bf16) with lane-dense channel count.
    _check(jax.random.normal(k4, (2, 256, 48, 48),
                             dtype=jnp.float32).astype(jnp.bfloat16))

    print("KERNEL_OK")
</pallas_src>

<mosaic_0001>
module attributes {stable_mosaic.version = 11 : i64} {
  func.func @_permute_kernel(%arg0: i32, %arg1: i32, %arg2: i32, %arg3: memref<1x256x1024xf32, #tpu.memory_space<vmem>>, %arg4: memref<1x1024x256xf32, #tpu.memory_space<vmem>>) attributes {dimension_semantics = [#tpu.dimension_semantics<parallel>, #tpu.dimension_semantics<parallel>, #tpu.dimension_semantics<parallel>], iteration_bounds = array<i64: 2, 1, 1>, scalar_prefetch = 0 : i64, scratch_operands = 0 : i64, tpu.core_type = #tpu.core_type<tc>, window_params = [{transform_indices = @transform_0, window_bounds = array<i64: 1, 256, 1024>}, {transform_indices = @transform_1, window_bounds = array<i64: 1, 1024, 256>}]} {
    %c0 = arith.constant 0 : index
    %c0_0 = arith.constant 0 : index
    %c0_1 = arith.constant 0 : index
    %0 = vector.load %arg3[%c0, %c0_0, %c0_1] : memref<1x256x1024xf32, #tpu.memory_space<vmem>>, vector<1x256x1024xf32>
    %1 = vector.shape_cast %0 : vector<1x256x1024xf32> to vector<256x1024xf32>
    %2 = tpu.transpose %1, [1, 0] : vector<256x1024xf32> -> vector<1024x256xf32>
    %c0_2 = arith.constant 0 : index
    %c0_3 = arith.constant 0 : index
    %c0_4 = arith.constant 0 : index
    %3 = vector.load %arg4[%c0_2, %c0_3, %c0_4] : memref<1x1024x256xf32, #tpu.memory_space<vmem>>, vector<1x1024x256xf32>
    %4 = vector.shape_cast %3 : vector<1x1024x256xf32> to vector<1024x256xf32>
    %5 = vector.shape_cast %2 : vector<1024x256xf32> to vector<1x1024x256xf32>
    tpu.vector_store %arg4[%c0_2, %c0_3, %c0_4], %5 {strides = array<i32>} : memref<1x1024x256xf32, #tpu.memory_space<vmem>>, vector<1x1024x256xf32>,
    return
  }
  func.func @transform_0(%arg0: i32, %arg1: i32, %arg2: i32) -> (i32, i32, i32) {
    %c0_i32 = arith.constant 0 : i32
    return %arg0, %arg1, %arg2 : i32, i32, i32
  }
  func.func @transform_1(%arg0: i32, %arg1: i32, %arg2: i32) -> (i32, i32, i32) {
    %c0_i32 = arith.constant 0 : i32
    return %arg0, %arg2, %arg1 : i32, i32, i32
  }
}

</mosaic_0001>

<bundles_post_ra>
// kernel: tpu_custom_call.1
= control target key start
LH: loop header
LB: loop body
LE: loop exit
PB: predicated region body
PF: predicated region fallthrough
CT: control target
= control target key end

     0   :  { %6 = vsyncpa [#allocation3], 0  ;;  %s2164_s0 = inlined_call_operand.hbm [shape: f32[2,256,1024], index: 0, kind: input, shape index: {}]   ;;  %s2165_s1 = inlined_call_operand.hbm [shape: f32[2,1024,256], index: 1, kind: output, shape index: {}]  }
   0x1   :  { %8 = vsyncpa [#allocation3 + $0x1], 0 }
   0x2   :  { %9 = vsyncpa [#allocation4], 0 }
   0x3   :  { %11 = vsyncpa [#allocation4 + $0x1], 0  ;;  %s1523_s6 = smov 0   ;;  %s1525_s7 = smov 0  }
   0x4   :  { %s1527_s8 = smov 0   ;;  %s1529_s9 = smov 0  }
   0x5   :  { %s1531_s10 = smov 0   ;;  %s1533_s11 = smov 0  }
   0x6 LB: > { %s1312_s12 = sadd.s32 4294967295, %s1507_s11   ;;  %s1313_s13 = sadd.s32 4294967294, %s1507_s11   ;;  %s1507_s11 = sphi %s1533_s11, %s17_s11   ;;  %s1503_s10 = sphi %s1531_s10, %s2174_s10   ;;  %s1499_s9 = sphi %s1529_s9, %s2173_s9   ;;  %s1495_s8 = sphi %s1527_s8, %s2172_s8   ;;  %s1491_s7 = sphi %s1525_s7, %s2171_s7   ;;  %s1487_s6 = sphi %s1523_s6, %s2170_s6  }
   0x7   : > { %s36_s14 = sadd.s32 1, %s1503_s10  ;;  %s47_s15 = sadd.s32 1, %s1495_s8 }
   0x8   : > { %p38_p0 = scmp.ge.s32.totalorder %s36_s14, 2  ;;  %p54_p1 = scmp.ne.s32.totalorder %s1495_s8, %s1491_s7 }
   0x9   : > { %p55_p2 = scmp.eq.s32.totalorder %s1507_s11, 0  ;;  %p60_p3 = scmp.ne.s32.totalorder %s1491_s7, %s1487_s6 }
   0xa   : > { %s2176_s14 = smov (%p38_p0, %s36_s14), 0  ;;  %p61_p5 = scmp.eq.s32.totalorder %s1312_s12, 0 }
   0xb   : > { %p1564_p4 = por %p55_p2, %p54_p1  ;;  %s40_s17 = ssub.s32 %s1503_s10, %s2176_s14 }
   0xc   : > { %p88_p6 = scmp.eq.s32.totalorder %s1312_s12, 1  ;;  %p45_p7 = scmp.eq.s32.totalorder %s40_s17, 0 }
   0xd   : > { %p1570_p8 = por %p61_p5, %p60_p3  ;;  %p94_p10 = scmp.eq.s32.totalorder %s1313_s13, 1 }
   0xe   : > { %p1574_p9 = por %p88_p6, %p54_p1  ;;  %p1315_p12 = scmp.ge.s32.totalorder %s1507_s11, 2 }
   0xf   : > { %s1579_s20 = scalar_select %p45_p7, %s1495_s8, %s47_s15  }
  0x10   : > { %p1581_p11 = por %p94_p10, %p60_p3  ;;  %p1341_p13 = scmp.lt.s32.totalorder %s1507_s11, 2 }
  0x11   : > { %s114_s22 = sand.u32 1, %s1495_s8   ;;  %s1327_s24 = sshll.u32 %s1503_s10, 11 }
  0x12   : > { %s1316_s23 = sshll.u32 %s114_s22, 11  ;;  %s128_s27 = scalar_lea.hbm %s2164_s0, %s1327_s24 }
  0x13   : > { %s118_s28 = scalar_lea.vmem [#allocation2], %s1316_s23  ;;  %s129_s30 = sshll.u32 %s128_s27, 4  ;;  %s130_s30 = int_to_ptr.hbm [resolvable:$true] %s129_s30 }
  0x14   : > { %s131_s29 = sshll.u32 %s118_s28, 4  ;;  %p1334_p0 = pnand %p1341_p13, %p1564_p4  ;;  %s132_s29 = int_to_ptr.vmem [resolvable:$true] %s131_s29 }
  0x15   : > { %p1319_p1 = scmp.ge.s32.totalorder %s1507_s11, 1  ;;  %s115_s2 = scalar_lea.sflag [#allocation3], %s114_s22 }
  0x16   : > { %s1509_s3 = smov 1024   ;;  %s1510_s4 = smov 64  }
  0x17   : > { %1336 = dma.hbm_to_vmem [thread:$0]  (!%p1334_p0), %s130_s30, 32768, %s132_s29, %s115_s2, %s1509_s3, %s1509_s3, %s1510_s4  }
  0x18   : > { %p139_p2 = scmp.lt.s32.totalorder %s1507_s11, 3 }
  0x1a   : > { %p140_p3 = pnand %p1319_p1, %p139_p2 }
  0x1b   : > { %s1597_s5 = sand.u32 (!%p140_p3), 1, %s1491_s7  }
  0x1c   : > { %143 = sbr.rel (%p140_p3) target bundleno = 964 (0x3c4), region = 24  ;;  %s1320_s12 = sshll.u32 (!%p140_p3), %s1597_s5, 11 }
  0x1d   : > { %s146_s13 = scalar_lea.sflag (!%p140_p3), [#allocation3], %s1597_s5  ;;  %s1603_s15 = scalar_lea.vmem (!%p140_p3), [#allocation2], %s1320_s12 }
  0x21   : > { %1478 = dma.done.wait (%p1570_p8), %s146_s13, 32768  }
  0x22   : > { %1480 = vsyncadd (%p1570_p8), %s146_s13, 4294934528  ;;  %v173_v0 = vld [vmem:[%s1603_s15] sm:$0xff]  ;;  %v174_v12 = vld [vmem:[%s1603_s15 + $0x8] sm:$0xff]  ;;  %s1649_s16 = scalar_lea.vmem [#allocation5], %s1320_s12  ;;  %s1328_s17 = sshll.u32 %s1499_s9, 11 }
  0x23   : > { %429 = vxpose.xlu0.b32.start [1/16] %v173_v0, 128  ;;  %v181_v1 = vld [vmem:[%s1603_s15 + $0x40] sm:$0xff]  ;;  %461 = vxpose.xlu1.b32.start [1/16] %v174_v12, 128  ;;  %v182_v14 = vld [vmem:[%s1603_s15 + $0x48] sm:$0xff]  ;;  %v175_v16 = vld [vmem:[%s1603_s15 + $0x10] sm:$0xff]  ;;  %s1214_s23 = scalar_lea.hbm %s2165_s1, %s1328_s17  ;;  %s1215_s24 = sshll.u32 %s1649_s16, 4  ;;  %s1216_s24 = int_to_ptr.vmem [resolvable:$true] %s1215_s24 }
  0x24   : > { %v189_v2 = vld [vmem:[%s1603_s15 + $0x80] sm:$0xff]  ;;  %v190_v17 = vld [vmem:[%s1603_s15 + $0x88] sm:$0xff]  ;;  %493 = vxpose.xlu2.b32.start [1/16] %v175_v16, 128  ;;  %v183_v19 = vld [vmem:[%s1603_s15 + $0x50] sm:$0xff]  ;;  %s1217_s25 = sshll.u32 %s1214_s23, 4  ;;  %s1198_s26 = scalar_lea.sflag [#allocation4], %s1597_s5  ;;  %s1218_s25 = int_to_ptr.hbm [resolvable:$true] %s1217_s25 }
  0x25   : > { %v197_v3 = vld [vmem:[%s1603_s15 + $0xc0] sm:$0xff]  ;;  %v198_v20 = vld [vmem:[%s1603_s15 + $0xc8] sm:$0xff]  ;;  %v191_v22 = vld [vmem:[%s1603_s15 + $0x90] sm:$0xff]  ;;  %s1439_s27 = sshra.s32 %s1218_s25, 4  ;;  %s1445_s30 = scalar_lea.hbm %s2165_s1, 4096  ;;  %s1440_s27 = int_to_ptr.hbm [resolvable:$true] %s1439_s27 }
  0x26   : > { %v205_v4 = vld [vmem:[%s1603_s15 + $0x100] sm:$0xff]  ;;  %v206_v23 = vld [vmem:[%s1603_s15 + $0x108] sm:$0xff]  ;;  %v176_v24 = vld [vmem:[%s1603_s15 + $0x18] sm:$0xff]  ;;  %s1441_s28 = scalar_lea.hbm %s1440_s27, 2048  ;;  %p1446_p7 = scmp.lt.s32.totalorder %s1440_s27, %s2165_s1 }
  0x27   : > { %v213_v5 = vld [vmem:[%s1603_s15 + $0x140] sm:$0xff]  ;;  %v199_v25 = vld [vmem:[%s1603_s15 + $0xd0] sm:$0xff]  ;;  %v184_v26 = vld [vmem:[%s1603_s15 + $0x58] sm:$0xff]  ;;  %p1442_p4 = scmp.ne.s32.totalorder %s1440_s27, %s1441_s28  ;;  %p1447_p8 = scmp.lt.s32.totalorder %s1445_s30, %s1441_s28 }
  0x28   : > { %v221_v6 = vld [vmem:[%s1603_s15 + $0x180] sm:$0xff]  ;;  %v214_v27 = vld [vmem:[%s1603_s15 + $0x148] sm:$0xff]  ;;  %v207_v28 = vld [vmem:[%s1603_s15 + $0x110] sm:$0xff] }
  0x29   : > { %v229_v7 = vld [vmem:[%s1603_s15 + $0x1c0] sm:$0xff]  ;;  %v192_v29 = vld [vmem:[%s1603_s15 + $0x98] sm:$0xff]  ;;  %v222_v30 = vld [vmem:[%s1603_s15 + $0x188] sm:$0xff]  ;;  %p1443_p5 = pnand %p1442_p4, %p1574_p9  ;;  %p1448_p10 = por %p1447_p8, %p1446_p7 }
  0x2a   : > { %v237_v8 = vld [vmem:[%s1603_s15 + $0x200] sm:$0xff]  ;;  %v215_v31 = vld [vmem:[%s1603_s15 + $0x150] sm:$0xff]  ;;  %v200_v32 = vld [vmem:[%s1603_s15 + $0xd8] sm:$0xff] }
  0x2b   : > { %430 = vxpose.xlu0.b32.cont [2/16] %v181_v1, 128  ;;  %v245_v9 = vld [vmem:[%s1603_s15 + $0x240] sm:$0xff]  ;;  %462 = vxpose.xlu1.b32.cont [2/16] %v182_v14, 128  ;;  %v230_v33 = vld [vmem:[%s1603_s15 + $0x1c8] sm:$0xff]  ;;  %v223_v34 = vld [vmem:[%s1603_s15 + $0x190] sm:$0xff]  ;;  %p1444_p6 = pneg %p1443_p5 }
  0x2c   : > { %v253_v10 = vld [vmem:[%s1603_s15 + $0x280] sm:$0xff]  ;;  %494 = vxpose.xlu2.b32.cont [2/16] %v183_v19, 128  ;;  %v208_v35 = vld [vmem:[%s1603_s15 + $0x118] sm:$0xff]  ;;  %v238_v36 = vld [vmem:[%s1603_s15 + $0x208] sm:$0xff] }
  0x2d   : > { %v261_v11 = vld [vmem:[%s1603_s15 + $0x2c0] sm:$0xff]  ;;  %v231_v37 = vld [vmem:[%s1603_s15 + $0x1d0] sm:$0xff]  ;;  %v216_v39 = vld [vmem:[%s1603_s15 + $0x158] sm:$0xff]  ;;  %p1449_p13 = pnand %p1448_p10, %p1444_p6 }
  0x2e   : > { %v269_v13 = vld [vmem:[%s1603_s15 + $0x300] sm:$0xff]  ;;  %v246_v40 = vld [vmem:[%s1603_s15 + $0x248] sm:$0xff]  ;;  %v239_v41 = vld [vmem:[%s1603_s15 + $0x210] sm:$0xff] }
  0x2f   : > { %v277_v15 = vld [vmem:[%s1603_s15 + $0x340] sm:$0xff]  ;;  %v224_v43 = vld [vmem:[%s1603_s15 + $0x198] sm:$0xff]  ;;  %v254_v44 = vld [vmem:[%s1603_s15 + $0x288] sm:$0xff] }
  0x30   : > { %v285_v18 = vld [vmem:[%s1603_s15 + $0x380] sm:$0xff]  ;;  %v247_v45 = vld [vmem:[%s1603_s15 + $0x250] sm:$0xff]  ;;  %v232_v47 = vld [vmem:[%s1603_s15 + $0x1d8] sm:$0xff] }
  0x31   : > { %v293_v21 = vld [vmem:[%s1603_s15 + $0x3c0] sm:$0xff]  ;;  %v262_v48 = vld [vmem:[%s1603_s15 + $0x2c8] sm:$0xff]  ;;  %v255_v49 = vld [vmem:[%s1603_s15 + $0x290] sm:$0xff] }
  0x32   : > { %v240_v51 = vld [vmem:[%s1603_s15 + $0x218] sm:$0xff]  ;;  %v270_v52 = vld [vmem:[%s1603_s15 + $0x308] sm:$0xff]  ;;  %v263_v53 = vld [vmem:[%s1603_s15 + $0x2d0] sm:$0xff] }
  0x33   : > { %431 = vxpose.xlu0.b32.cont [3/16] %v189_v2, 128  ;;  %463 = vxpose.xlu1.b32.cont [3/16] %v190_v17, 128  ;;  %v248_v55 = vld [vmem:[%s1603_s15 + $0x258] sm:$0xff]  ;;  %v278_v56 = vld [vmem:[%s1603_s15 + $0x348] sm:$0xff]  ;;  %v271_v57 = vld [vmem:[%s1603_s15 + $0x310] sm:$0xff] }
  0x34   : > { %495 = vxpose.xlu2.b32.cont [3/16] %v191_v22, 128  ;;  %v256_v59 = vld [vmem:[%s1603_s15 + $0x298] sm:$0xff]  ;;  %v286_v60 = vld [vmem:[%s1603_s15 + $0x388] sm:$0xff]  ;;  %v279_v61 = vld [vmem:[%s1603_s15 + $0x350] sm:$0xff] }
  0x35   : > { %v264_v63 = vld [vmem:[%s1603_s15 + $0x2d8] sm:$0xff]  ;;  %v294_v0 = vld [vmem:[%s1603_s15 + $0x3c8] sm:$0xff]  ;;  %v287_v1 = vld [vmem:[%s1603_s15 + $0x390] sm:$0xff] }
  0x36   : > { %v193_v12 = vld [vmem:[%s1603_s15 + $0xa0] sm:$0xff]  ;;  %v194_v17 = vld [vmem:[%s1603_s15 + $0xa8] sm:$0xff]  ;;  %v179_v19 = vld [vmem:[%s1603_s15 + $0x30] sm:$0xff] }
  0x37   : > { %v201_v16 = vld [vmem:[%s1603_s15 + $0xe0] sm:$0xff] }
  0x3b   : > { %432 = vxpose.xlu0.b32.cont [4/16] %v197_v3, 128  ;;  %464 = vxpose.xlu1.b32.cont [4/16] %v198_v20, 128  ;;  %v272_v3 = vld [vmem:[%s1603_s15 + $0x318] sm:$0xff]  ;;  %v209_v20 = vld [vmem:[%s1603_s15 + $0x120] sm:$0xff] }
  0x3c   : > { %496 = vxpose.xlu2.b32.cont [4/16] %v199_v25, 128  ;;  %v187_v25 = vld [vmem:[%s1603_s15 + $0x70] sm:$0xff] }
  0x43   : > { %433 = vxpose.xlu0.b32.cont [5/16] %v205_v4, 128  ;;  %465 = vxpose.xlu1.b32.cont [5/16] %v206_v23, 128  ;;  %v177_v4 = vld [vmem:[%s1603_s15 + $0x20] sm:$0xff] }
  0x44   : > { %497 = vxpose.xlu2.b32.cont [5/16] %v207_v28, 128 }
  0x4b   : > { %434 = vxpose.xlu0.b32.cont [6/16] %v213_v5, 128  ;;  %466 = vxpose.xlu1.b32.cont [6/16] %v214_v27, 128  ;;  %v295_v5 = vld [vmem:[%s1603_s15 + $0x3d0] sm:$0xff]  ;;  %v210_v27 = vld [vmem:[%s1603_s15 + $0x128] sm:$0xff] }
  0x4c   : > { %498 = vxpose.xlu2.b32.cont [6/16] %v215_v31, 128  ;;  %v195_v31 = vld [vmem:[%s1603_s15 + $0xb0] sm:$0xff] }
  0x53   : > { %435 = vxpose.xlu0.b32.cont [7/16] %v221_v6, 128  ;;  %467 = vxpose.xlu1.b32.cont [7/16] %v222_v30, 128 }
  0x54   : > { %499 = vxpose.xlu2.b32.cont [7/16] %v223_v34, 128 }
  0x5b   : > { %436 = vxpose.xlu0.b32.cont [8/16] %v229_v7, 128  ;;  %468 = vxpose.xlu1.b32.cont [8/16] %v230_v33, 128  ;;  %v280_v7 = vld [vmem:[%s1603_s15 + $0x358] sm:$0xff]  ;;  %v218_v33 = vld [vmem:[%s1603_s15 + $0x168] sm:$0xff] }
  0x5c   : > { %500 = vxpose.xlu2.b32.cont [8/16] %v231_v37, 128  ;;  %v203_v37 = vld [vmem:[%s1603_s15 + $0xf0] sm:$0xff] }
  0x63   : > { %437 = vxpose.xlu0.b32.cont [9/16] %v237_v8, 128  ;;  %469 = vxpose.xlu1.b32.cont [9/16] %v238_v36, 128  ;;  %v185_v8 = vld [vmem:[%s1603_s15 + $0x60] sm:$0xff] }
  0x64   : > { %501 = vxpose.xlu2.b32.cont [9/16] %v239_v41, 128 }
  0x6b   : > { %438 = vxpose.xlu0.b32.cont [10/16] %v245_v9, 128  ;;  %470 = vxpose.xlu1.b32.cont [10/16] %v246_v40, 128  ;;  %v178_v9 = vld [vmem:[%s1603_s15 + $0x28] sm:$0xff] }
  0x6c   : > { %502 = vxpose.xlu2.b32.cont [10/16] %v247_v45, 128  ;;  %v234_v45 = vld [vmem:[%s1603_s15 + $0x1e8] sm:$0xff] }
  0x73   : > { %439 = vxpose.xlu0.b32.cont [11/16] %v253_v10, 128  ;;  %471 = vxpose.xlu1.b32.cont [11/16] %v254_v44, 128  ;;  %v241_v44 = vld [vmem:[%s1603_s15 + $0x220] sm:$0xff] }
  0x74   : > { %503 = vxpose.xlu2.b32.cont [11/16] %v255_v49, 128  ;;  %v219_v49 = vld [vmem:[%s1603_s15 + $0x170] sm:$0xff] }
  0x7b   : > { %440 = vxpose.xlu0.b32.cont [12/16] %v261_v11, 128  ;;  %472 = vxpose.xlu1.b32.cont [12/16] %v262_v48, 128  ;;  %v288_v11 = vld [vmem:[%s1603_s15 + $0x398] sm:$0xff] }
  0x7c   : > { %504 = vxpose.xlu2.b32.cont [12/16] %v263_v53, 128 }
  0x83   : > { %441 = vxpose.xlu0.b32.cont [13/16] %v269_v13, 128  ;;  %473 = vxpose.xlu1.b32.cont [13/16] %v270_v52, 128  ;;  %v186_v13 = vld [vmem:[%s1603_s15 + $0x68] sm:$0xff] }
  0x84   : > { %505 = vxpose.xlu2.b32.cont [13/16] %v271_v57, 128  ;;  %v250_v57 = vld [vmem:[%s1603_s15 + $0x268] sm:$0xff] }
  0x8b   : > { %442 = vxpose.xlu0.b32.cont [14/16] %v277_v15, 128  ;;  %474 = vxpose.xlu1.b32.cont [14/16] %v278_v56, 128  ;;  %v296_v15 = vld [vmem:[%s1603_s15 + $0x3d8] sm:$0xff]  ;;  %v257_v56 = vld [vmem:[%s1603_s15 + $0x2a0] sm:$0xff] }
  0x8c   : > { %506 = vxpose.xlu2.b32.cont [14/16] %v279_v61, 128  ;;  %v235_v61 = vld [vmem:[%s1603_s15 + $0x1f0] sm:$0xff] }
  0x93   : > { %443 = vxpose.xlu0.b32.cont [15/16] %v285_v18, 128  ;;  %475 = vxpose.xlu1.b32.cont [15/16] %v286_v60, 128 }
  0x94   : > { %507 = vxpose.xlu2.b32.cont [15/16] %v287_v1, 128 }
  0x9b   : > { %444 = vxpose.xlu0.b32.end [16/16] %v293_v21, 128  ;;  %476 = vxpose.xlu1.b32.end [16/16] %v294_v0, 128  ;;  %v202_v21 = vld [vmem:[%s1603_s15 + $0xe8] sm:$0xff] }
  0x9c   : > { %508 = vxpose.xlu2.b32.end [16/16] %v295_v5, 128  ;;  %v266_v5 = vld [vmem:[%s1603_s15 + $0x2e8] sm:$0xff] }
  0xa3   : > { %525 = vxpose.xlu0.b32.start [1/16] %v176_v24, 128  ;;  %557 = vxpose.xlu1.b32.start [1/16] %v177_v4, 128  ;;  %v273_v4 = vld [vmem:[%s1603_s15 + $0x320] sm:$0xff] }
  0xa4   : > { %589 = vxpose.xlu2.b32.start [1/16] %v178_v9, 128  ;;  %v251_v9 = vld [vmem:[%s1603_s15 + $0x270] sm:$0xff] }
  0xab   : > { %526 = vxpose.xlu0.b32.cont [2/16] %v184_v26, 128  ;;  %558 = vxpose.xlu1.b32.cont [2/16] %v185_v8, 128  ;;  %v217_v26 = vld [vmem:[%s1603_s15 + $0x160] sm:$0xff] }
  0xac   : > { %590 = vxpose.xlu2.b32.cont [2/16] %v186_v13, 128 }
  0xb3   : > { %527 = vxpose.xlu0.b32.cont [3/16] %v192_v29, 128  ;;  %559 = vxpose.xlu1.b32.cont [3/16] %v193_v12, 128 }
  0xb4   : > { %591 = vxpose.xlu2.b32.cont [3/16] %v194_v17, 128  ;;  %v282_v17 = vld [vmem:[%s1603_s15 + $0x368] sm:$0xff] }
  0xbb   : > { %528 = vxpose.xlu0.b32.cont [4/16] %v200_v32, 128  ;;  %560 = vxpose.xlu1.b32.cont [4/16] %v201_v16, 128  ;;  %v225_v32 = vld [vmem:[%s1603_s15 + $0x1a0] sm:$0xff] }
  0xbc   : > { %592 = vxpose.xlu2.b32.cont [4/16] %v202_v21, 128  ;;  %v289_v16 = vld [vmem:[%s1603_s15 + $0x3a0] sm:$0xff]  ;;  %v267_v21 = vld [vmem:[%s1603_s15 + $0x2f0] sm:$0xff] }
  0xbd   : > { %v509_v22 = vpop.trf.xlu2 }
  0xbe   : > { %1005 = vst [vmem:[%s1649_s16 + $0x200] sm:$0xff] %v509_v22  ;;  %v297_v22 = vld [vmem:[%s1603_s15 + $0x3e0] sm:$0xff] }
  0xc3   : > { %529 = vxpose.xlu0.b32.cont [5/16] %v208_v35, 128  ;;  %561 = vxpose.xlu1.b32.cont [5/16] %v209_v20, 128 }
  0xc4   : > { %593 = vxpose.xlu2.b32.cont [5/16] %v210_v27, 128  ;;  %v275_v27 = vld [vmem:[%s1603_s15 + $0x330] sm:$0xff] }
  0xc5   : > { %v510_v28 = vpop.trf.xlu2 }
  0xc6   : > { %1007 = vst [vmem:[%s1649_s16 + $0x210] sm:$0xff] %v510_v28  ;;  %v180_v28 = vld [vmem:[%s1603_s15 + $0x38] sm:$0xff] }
  0xc7   : > { %v445_v38 = vpop.trf.xlu0  ;;  %v477_v23 = vpop.trf.xlu1 }
  0xc8   : > { %941 = vst [vmem:[%s1649_s16] sm:$0xff] %v445_v38  ;;  %v233_v38 = vld [vmem:[%s1603_s15 + $0x1e0] sm:$0xff] }
  0xc9   : > { %973 = vst [vmem:[%s1649_s16 + $0x100] sm:$0xff] %v477_v23  ;;  %v290_v23 = vld [vmem:[%s1603_s15 + $0x3a8] sm:$0xff] }
  0xcb   : > { %530 = vxpose.xlu0.b32.cont [6/16] %v216_v39, 128  ;;  %562 = vxpose.xlu1.b32.cont [6/16] %v217_v26, 128  ;;  %v226_v39 = vld [vmem:[%s1603_s15 + $0x1a8] sm:$0xff] }
  0xcc   : > { %594 = vxpose.xlu2.b32.cont [6/16] %v218_v33, 128  ;;  %v283_v33 = vld [vmem:[%s1603_s15 + $0x370] sm:$0xff] }
  0xcd   : > { %v511_v34 = vpop.trf.xlu2 }
  0xce   : > { %1009 = vst [vmem:[%s1649_s16 + $0x220] sm:$0xff] %v511_v34  ;;  %v188_v34 = vld [vmem:[%s1603_s15 + $0x78] sm:$0xff] }
  0xcf   : > { %v446_v42 = vpop.trf.xlu0  ;;  %v478_v29 = vpop.trf.xlu1 }
  0xd0   : > { %943 = vst [vmem:[%s1649_s16 + $0x10] sm:$0xff] %v446_v42 }
  0xd1   : > { %975 = vst [vmem:[%s1649_s16 + $0x110] sm:$0xff] %v478_v29  ;;  %v298_v29 = vld [vmem:[%s1603_s15 + $0x3e8] sm:$0xff] }
  0xd3   : > { %531 = vxpose.xlu0.b32.cont [7/16] %v224_v43, 128  ;;  %563 = vxpose.xlu1.b32.cont [7/16] %v225_v32, 128  ;;  %v211_v43 = vld [vmem:[%s1603_s15 + $0x130] sm:$0xff] }
  0xd4   : > { %595 = vxpose.xlu2.b32.cont [7/16] %v226_v39, 128  ;;  %v291_v39 = vld [vmem:[%s1603_s15 + $0x3b0] sm:$0xff] }
  0xd5   : > { %v512_v40 = vpop.trf.xlu2 }
  0xd6   : > { %1011 = vst [vmem:[%s1649_s16 + $0x230] sm:$0xff] %v512_v40  ;;  %v196_v40 = vld [vmem:[%s1603_s15 + $0xb8] sm:$0xff] }
  0xd7   : > { %v447_v46 = vpop.trf.xlu0  ;;  %v479_v35 = vpop.trf.xlu1 }
  0xd8   : > { %945 = vst [vmem:[%s1649_s16 + $0x20] sm:$0xff] %v447_v46 }
  0xd9   : > { %977 = vst [vmem:[%s1649_s16 + $0x120] sm:$0xff] %v479_v35  ;;  %v301_v35 = vld [vmem:[%s1603_s15 + $0x400] sm:$0xff] }
  0xdb   : > { %532 = vxpose.xlu0.b32.cont [8/16] %v232_v47, 128  ;;  %564 = vxpose.xlu1.b32.cont [8/16] %v233_v38, 128 }
  0xdc   : > { %596 = vxpose.xlu2.b32.cont [8/16] %v234_v45, 128  ;;  %v299_v45 = vld [vmem:[%s1603_s15 + $0x3f0] sm:$0xff] }
  0xdd   : > { %v513_v46 = vpop.trf.xlu2 }
  0xde   : > { %1013 = vst [vmem:[%s1649_s16 + $0x240] sm:$0xff] %v513_v46  ;;  %v204_v46 = vld [vmem:[%s1603_s15 + $0xf8] sm:$0xff] }
  0xdf   : > { %v448_v50 = vpop.trf.xlu0  ;;  %v480_v41 = vpop.trf.xlu1 }
  0xe0   : > { %947 = vst [vmem:[%s1649_s16 + $0x30] sm:$0xff] %v448_v50  ;;  %v249_v50 = vld [vmem:[%s1603_s15 + $0x260] sm:$0xff] }
  0xe1   : > { %979 = vst [vmem:[%s1649_s16 + $0x130] sm:$0xff] %v480_v41  ;;  %v309_v41 = vld [vmem:[%s1603_s15 + $0x440] sm:$0xff] }
  0xe3   : > { %533 = vxpose.xlu0.b32.cont [9/16] %v240_v51, 128  ;;  %565 = vxpose.xlu1.b32.cont [9/16] %v241_v44, 128  ;;  %v242_v51 = vld [vmem:[%s1603_s15 + $0x228] sm:$0xff] }
  0xe4   : > { %597 = vxpose.xlu2.b32.cont [9/16] %v242_v51, 128  ;;  %v302_v51 = vld [vmem:[%s1603_s15 + $0x408] sm:$0xff] }
  0xe5   : > { %v514_v52 = vpop.trf.xlu2 }
  0xe6   : > { %1015 = vst [vmem:[%s1649_s16 + $0x250] sm:$0xff] %v514_v52  ;;  %v212_v52 = vld [vmem:[%s1603_s15 + $0x138] sm:$0xff] }
  0xe7   : > { %v449_v54 = vpop.trf.xlu0  ;;  %v481_v47 = vpop.trf.xlu1 }
  0xe8   : > { %949 = vst [vmem:[%s1649_s16 + $0x40] sm:$0xff] %v449_v54 }
  0xe9   : > { %981 = vst [vmem:[%s1649_s16 + $0x140] sm:$0xff] %v481_v47  ;;  %v317_v47 = vld [vmem:[%s1603_s15 + $0x480] sm:$0xff] }
  0xeb   : > { %534 = vxpose.xlu0.b32.cont [10/16] %v248_v55, 128  ;;  %566 = vxpose.xlu1.b32.cont [10/16] %v249_v50, 128  ;;  %v227_v55 = vld [vmem:[%s1603_s15 + $0x1b0] sm:$0xff] }
  0xec   : > { %598 = vxpose.xlu2.b32.cont [10/16] %v250_v57, 128  ;;  %v310_v57 = vld [vmem:[%s1603_s15 + $0x448] sm:$0xff] }
  0xef   : > { %v450_v58 = vpop.trf.xlu0  ;;  %v482_v53 = vpop.trf.xlu1 }
  0xf0   : > { %951 = vst [vmem:[%s1649_s16 + $0x50] sm:$0xff] %v450_v58  ;;  %v515_v58 = vpop.trf.xlu2 }
  0xf1   : > { %983 = vst [vmem:[%s1649_s16 + $0x150] sm:$0xff] %v482_v53  ;;  %v325_v53 = vld [vmem:[%s1603_s15 + $0x4c0] sm:$0xff] }
  0xf2   : > { %1017 = vst [vmem:[%s1649_s16 + $0x260] sm:$0xff] %v515_v58  ;;  %v220_v58 = vld [vmem:[%s1603_s15 + $0x178] sm:$0xff] }
  0xf3   : > { %535 = vxpose.xlu0.b32.cont [11/16] %v256_v59, 128  ;;  %567 = vxpose.xlu1.b32.cont [11/16] %v257_v56, 128 }
  0xf7   : > { %v451_v62 = vpop.trf.xlu0  ;;  %v483_v59 = vpop.trf.xlu1 }
  0xf8   : > { %953 = vst [vmem:[%s1649_s16 + $0x60] sm:$0xff] %v451_v62  ;;  %v265_v62 = vld [vmem:[%s1603_s15 + $0x2e0] sm:$0xff]  ;;  %v516_v0 = vpop.trf.xlu2 }
  0xf9   : > { %985 = vst [vmem:[%s1649_s16 + $0x160] sm:$0xff] %v483_v59  ;;  %v333_v59 = vld [vmem:[%s1603_s15 + $0x500] sm:$0xff] }
  0xfa   : > { %1019 = vst [vmem:[%s1649_s16 + $0x270] sm:$0xff] %v516_v0  ;;  %v228_v0 = vld [vmem:[%s1603_s15 + $0x1b8] sm:$0xff] }
  0xfb   : > { %536 = vxpose.xlu0.b32.cont [12/16] %v264_v63, 128  ;;  %568 = vxpose.xlu1.b32.cont [12/16] %v265_v62, 128  ;;  %v258_v63 = vld [vmem:[%s1603_s15 + $0x2a8] sm:$0xff] }
  0xfc   : > { %599 = vxpose.xlu2.b32.cont [11/16] %v258_v63, 128  ;;  %v318_v63 = vld [vmem:[%s1603_s15 + $0x488] sm:$0xff] }
  0xff   : > { %v452_v2 = vpop.trf.xlu0  ;;  %v484_v1 = vpop.trf.xlu1 }
 0x100   : > { %955 = vst [vmem:[%s1649_s16 + $0x70] sm:$0xff] %v452_v2 }
 0x101   : > { %987 = vst [vmem:[%s1649_s16 + $0x170] sm:$0xff] %v484_v1  ;;  %v341_v1 = vld [vmem:[%s1603_s15 + $0x540] sm:$0xff] }
 0x103   : > { %537 = vxpose.xlu0.b32.cont [13/16] %v272_v3, 128  ;;  %v243_v3 = vld [vmem:[%s1603_s15 + $0x230] sm:$0xff]  ;;  %569 = vxpose.xlu1.b32.cont [13/16] %v273_v4, 128 }
 0x104   : > { %600 = vxpose.xlu2.b32.cont [12/16] %v266_v5, 128  ;;  %v326_v5 = vld [vmem:[%s1603_s15 + $0x4c8] sm:$0xff] }
 0x107   : > { %v453_v6 = vpop.trf.xlu0 }
 0x108   : > { %957 = vst [vmem:[%s1649_s16 + $0x80] sm:$0xff] %v453_v6  ;;  %v517_v6 = vpop.trf.xlu2 }
 0x109   : > { %1021 = vst [vmem:[%s1649_s16 + $0x280] sm:$0xff] %v517_v6  ;;  %v236_v6 = vld [vmem:[%s1603_s15 + $0x1f8] sm:$0xff] }
 0x10b   : > { %538 = vxpose.xlu0.b32.cont [14/16] %v280_v7, 128  ;;  %v485_v7 = vpop.trf.xlu1 }
 0x10c   : > { %989 = vst [vmem:[%s1649_s16 + $0x180] sm:$0xff] %v485_v7  ;;  %v349_v7 = vld [vmem:[%s1603_s15 + $0x580] sm:$0xff] }
 0x10f   : > { %v454_v10 = vpop.trf.xlu0 }
 0x110   : > { %959 = vst [vmem:[%s1649_s16 + $0x90] sm:$0xff] %v454_v10  ;;  %v281_v10 = vld [vmem:[%s1603_s15 + $0x360] sm:$0xff]  ;;  %v518_v12 = vpop.trf.xlu2 }
 0x111   : > { %570 = vxpose.xlu1.b32.cont [14/16] %v281_v10, 128  ;;  %1023 = vst [vmem:[%s1649_s16 + $0x290] sm:$0xff] %v518_v12  ;;  %v244_v12 = vld [vmem:[%s1603_s15 + $0x238] sm:$0xff] }
 0x113   : > { %539 = vxpose.xlu0.b32.cont [15/16] %v288_v11, 128  ;;  %v274_v11 = vld [vmem:[%s1603_s15 + $0x328] sm:$0xff]  ;;  %v486_v13 = vpop.trf.xlu1 }
 0x114   : > { %601 = vxpose.xlu2.b32.cont [13/16] %v274_v11, 128  ;;  %991 = vst [vmem:[%s1649_s16 + $0x190] sm:$0xff] %v486_v13  ;;  %v334_v11 = vld [vmem:[%s1603_s15 + $0x508] sm:$0xff]  ;;  %v357_v13 = vld [vmem:[%s1603_s15 + $0x5c0] sm:$0xff] }
 0x117   : > { %v455_v14 = vpop.trf.xlu0 }
 0x118   : > { %961 = vst [vmem:[%s1649_s16 + $0xa0] sm:$0xff] %v455_v14 }
 0x119   : > { %571 = vxpose.xlu1.b32.cont [15/16] %v289_v16, 128 }
 0x11b   : > { %540 = vxpose.xlu0.b32.end [16/16] %v296_v15, 128  ;;  %v259_v15 = vld [vmem:[%s1603_s15 + $0x2b0] sm:$0xff] }
 0x11c   : > { %602 = vxpose.xlu2.b32.cont [14/16] %v282_v17, 128  ;;  %v342_v17 = vld [vmem:[%s1603_s15 + $0x548] sm:$0xff] }
 0x11f   : > { %v456_v18 = vpop.trf.xlu0 }
 0x120   : > { %963 = vst [vmem:[%s1649_s16 + $0xb0] sm:$0xff] %v456_v18  ;;  %v519_v18 = vpop.trf.xlu2 }
 0x121   : > { %1025 = vst [vmem:[%s1649_s16 + $0x2a0] sm:$0xff] %v519_v18  ;;  %572 = vxpose.xlu1.b32.end [16/16] %v297_v22, 128  ;;  %v252_v18 = vld [vmem:[%s1603_s15 + $0x278] sm:$0xff] }
 0x123   : > { %621 = vxpose.xlu0.b32.start [1/16] %v179_v19, 128  ;;  %v487_v19 = vpop.trf.xlu1 }
 0x124   : > { %993 = vst [vmem:[%s1649_s16 + $0x1a0] sm:$0xff] %v487_v19  ;;  %603 = vxpose.xlu2.b32.cont [15/16] %v290_v23, 128  ;;  %v365_v19 = vld [vmem:[%s1603_s15 + $0x600] sm:$0xff]  ;;  %v350_v23 = vld [vmem:[%s1603_s15 + $0x588] sm:$0xff] }
 0x127   : > { %v457_v24 = vpop.trf.xlu0 }
 0x128   : > { %965 = vst [vmem:[%s1649_s16 + $0xc0] sm:$0xff] %v457_v24  ;;  %v520_v24 = vpop.trf.xlu2 }
 0x129   : > { %1027 = vst [vmem:[%s1649_s16 + $0x2b0] sm:$0xff] %v520_v24  ;;  %653 = vxpose.xlu1.b32.start [1/16] %v180_v28, 128  ;;  %v260_v24 = vld [vmem:[%s1603_s15 + $0x2b8] sm:$0xff] }
 0x12b   : > { %622 = vxpose.xlu0.b32.cont [2/16] %v187_v25, 128  ;;  %v488_v25 = vpop.trf.xlu1 }
 0x12c   : > { %995 = vst [vmem:[%s1649_s16 + $0x1b0] sm:$0xff] %v488_v25  ;;  %604 = vxpose.xlu2.b32.end [16/16] %v298_v29, 128  ;;  %v373_v25 = vld [vmem:[%s1603_s15 + $0x640] sm:$0xff]  ;;  %v358_v29 = vld [vmem:[%s1603_s15 + $0x5c8] sm:$0xff] }
 0x12f   : > { %v458_v30 = vpop.trf.xlu0 }
 0x130   : > { %967 = vst [vmem:[%s1649_s16 + $0xd0] sm:$0xff] %v458_v30  ;;  %v521_v30 = vpop.trf.xlu2 }
 0x131   : > { %1029 = vst [vmem:[%s1649_s16 + $0x2c0] sm:$0xff] %v521_v30  ;;  %654 = vxpose.xlu1.b32.cont [2/16] %v188_v34, 128  ;;  %v268_v30 = vld [vmem:[%s1603_s15 + $0x2f8] sm:$0xff] }
 0x133   : > { %623 = vxpose.xlu0.b32.cont [3/16] %v195_v31, 128  ;;  %v489_v31 = vpop.trf.xlu1 }
 0x134   : > { %997 = vst [vmem:[%s1649_s16 + $0x1c0] sm:$0xff] %v489_v31  ;;  %685 = vxpose.xlu2.b32.start [1/16] %v301_v35, 128  ;;  %v381_v31 = vld [vmem:[%s1603_s15 + $0x680] sm:$0xff]  ;;  %v366_v35 = vld [vmem:[%s1603_s15 + $0x608] sm:$0xff] }
 0x137   : > { %v459_v36 = vpop.trf.xlu0 }
 0x138   : > { %969 = vst [vmem:[%s1649_s16 + $0xe0] sm:$0xff] %v459_v36  ;;  %v522_v36 = vpop.trf.xlu2 }
 0x139   : > { %1031 = vst [vmem:[%s1649_s16 + $0x2d0] sm:$0xff] %v522_v36  ;;  %655 = vxpose.xlu1.b32.cont [3/16] %v196_v40, 128  ;;  %v276_v36 = vld [vmem:[%s1603_s15 + $0x338] sm:$0xff] }
 0x13b   : > { %624 = vxpose.xlu0.b32.cont [4/16] %v203_v37, 128  ;;  %v490_v37 = vpop.trf.xlu1 }
 0x13c   : > { %999 = vst [vmem:[%s1649_s16 + $0x1d0] sm:$0xff] %v490_v37  ;;  %686 = vxpose.xlu2.b32.cont [2/16] %v309_v41, 128  ;;  %v389_v37 = vld [vmem:[%s1603_s15 + $0x6c0] sm:$0xff]  ;;  %v374_v41 = vld [vmem:[%s1603_s15 + $0x648] sm:$0xff] }
 0x13f   : > { %v460_v42 = vpop.trf.xlu0 }
 0x140   : > { %971 = vst [vmem:[%s1649_s16 + $0xf0] sm:$0xff] %v460_v42  ;;  %v523_v42 = vpop.trf.xlu2 }
 0x141   : > { %1033 = vst [vmem:[%s1649_s16 + $0x2e0] sm:$0xff] %v523_v42  ;;  %656 = vxpose.xlu1.b32.cont [4/16] %v204_v46, 128  ;;  %v284_v42 = vld [vmem:[%s1603_s15 + $0x378] sm:$0xff] }
 0x143   : > { %625 = vxpose.xlu0.b32.cont [5/16] %v211_v43, 128  ;;  %v491_v43 = vpop.trf.xlu1 }
 0x144   : > { %1001 = vst [vmem:[%s1649_s16 + $0x1e0] sm:$0xff] %v491_v43  ;;  %687 = vxpose.xlu2.b32.cont [3/16] %v317_v47, 128  ;;  %v397_v43 = vld [vmem:[%s1603_s15 + $0x700] sm:$0xff]  ;;  %v382_v47 = vld [vmem:[%s1603_s15 + $0x688] sm:$0xff] }
 0x147   : > { %v541_v48 = vpop.trf.xlu0 }
 0x148   : > { %1037 = vst [vmem:[%s1649_s16 + $0x300] sm:$0xff] %v541_v48  ;;  %v524_v48 = vpop.trf.xlu2 }
 0x149   : > { %1035 = vst [vmem:[%s1649_s16 + $0x2f0] sm:$0xff] %v524_v48  ;;  %657 = vxpose.xlu1.b32.cont [5/16] %v212_v52, 128  ;;  %v292_v48 = vld [vmem:[%s1603_s15 + $0x3b8] sm:$0xff] }
 0x14b   : > { %626 = vxpose.xlu0.b32.cont [6/16] %v219_v49, 128  ;;  %v492_v49 = vpop.trf.xlu1 }
 0x14c   : > { %1003 = vst [vmem:[%s1649_s16 + $0x1f0] sm:$0xff] %v492_v49  ;;  %688 = vxpose.xlu2.b32.cont [4/16] %v325_v53, 128  ;;  %v405_v49 = vld [vmem:[%s1603_s15 + $0x740] sm:$0xff]  ;;  %v390_v53 = vld [vmem:[%s1603_s15 + $0x6c8] sm:$0xff] }
 0x14f   : > { %v542_v54 = vpop.trf.xlu0 }
 0x150   : > { %1039 = vst [vmem:[%s1649_s16 + $0x310] sm:$0xff] %v542_v54  ;;  %v605_v54 = vpop.trf.xlu2 }
 0x151   : > { %1101 = vst [vmem:[%s1649_s16 + $0x500] sm:$0xff] %v605_v54  ;;  %658 = vxpose.xlu1.b32.cont [6/16] %v220_v58, 128  ;;  %v300_v54 = vld [vmem:[%s1603_s15 + $0x3f8] sm:$0xff] }
 0x153   : > { %627 = vxpose.xlu0.b32.cont [7/16] %v227_v55, 128  ;;  %v573_v55 = vpop.trf.xlu1 }
 0x154   : > { %1069 = vst [vmem:[%s1649_s16 + $0x400] sm:$0xff] %v573_v55  ;;  %689 = vxpose.xlu2.b32.cont [5/16] %v333_v59, 128  ;;  %v413_v55 = vld [vmem:[%s1603_s15 + $0x780] sm:$0xff]  ;;  %v398_v59 = vld [vmem:[%s1603_s15 + $0x708] sm:$0xff] }
 0x157   : > { %v543_v60 = vpop.trf.xlu0 }
 0x158   : > { %1041 = vst [vmem:[%s1649_s16 + $0x320] sm:$0xff] %v543_v60  ;;  %v606_v60 = vpop.trf.xlu2 }
 0x159   : > { %1103 = vst [vmem:[%s1649_s16 + $0x510] sm:$0xff] %v606_v60  ;;  %659 = vxpose.xlu1.b32.cont [7/16] %v228_v0, 128  ;;  %v303_v60 = vld [vmem:[%s1603_s15 + $0x410] sm:$0xff] }
 0x15b   : > { %628 = vxpose.xlu0.b32.cont [8/16] %v235_v61, 128  ;;  %v574_v61 = vpop.trf.xlu1 }
 0x15c   : > { %1071 = vst [vmem:[%s1649_s16 + $0x410] sm:$0xff] %v574_v61  ;;  %690 = vxpose.xlu2.b32.cont [6/16] %v341_v1, 128  ;;  %v421_v61 = vld [vmem:[%s1603_s15 + $0x7c0] sm:$0xff]  ;;  %v406_v1 = vld [vmem:[%s1603_s15 + $0x748] sm:$0xff] }
 0x15f   : > { %v544_v2 = vpop.trf.xlu0 }
 0x160   : > { %1043 = vst [vmem:[%s1649_s16 + $0x330] sm:$0xff] %v544_v2  ;;  %v607_v2 = vpop.trf.xlu2 }
 0x161   : > { %1105 = vst [vmem:[%s1649_s16 + $0x520] sm:$0xff] %v607_v2  ;;  %660 = vxpose.xlu1.b32.cont [8/16] %v236_v6, 128  ;;  %v311_v2 = vld [vmem:[%s1603_s15 + $0x450] sm:$0xff] }
 0x163   : > { %629 = vxpose.xlu0.b32.cont [9/16] %v243_v3, 128  ;;  %v575_v3 = vpop.trf.xlu1 }
 0x164   : > { %1073 = vst [vmem:[%s1649_s16 + $0x420] sm:$0xff] %v575_v3  ;;  %691 = vxpose.xlu2.b32.cont [7/16] %v349_v7, 128  ;;  %v304_v3 = vld [vmem:[%s1603_s15 + $0x418] sm:$0xff]  ;;  %v414_v7 = vld [vmem:[%s1603_s15 + $0x788] sm:$0xff] }
 0x167   : > { %v545_v8 = vpop.trf.xlu0 }
 0x168   : > { %1045 = vst [vmem:[%s1649_s16 + $0x340] sm:$0xff] %v545_v8  ;;  %v608_v8 = vpop.trf.xlu2 }
 0x169   : > { %1107 = vst [vmem:[%s1649_s16 + $0x530] sm:$0xff] %v608_v8  ;;  %661 = vxpose.xlu1.b32.cont [9/16] %v244_v12, 128  ;;  %v319_v8 = vld [vmem:[%s1603_s15 + $0x490] sm:$0xff] }
 0x16b   : > { %630 = vxpose.xlu0.b32.cont [10/16] %v251_v9, 128  ;;  %v576_v9 = vpop.trf.xlu1 }
 0x16c   : > { %1075 = vst [vmem:[%s1649_s16 + $0x430] sm:$0xff] %v576_v9  ;;  %692 = vxpose.xlu2.b32.cont [8/16] %v357_v13, 128  ;;  %v312_v9 = vld [vmem:[%s1603_s15 + $0x458] sm:$0xff]  ;;  %v422_v13 = vld [vmem:[%s1603_s15 + $0x7c8] sm:$0xff] }
 0x16f   : > { %v546_v14 = vpop.trf.xlu0 }
 0x170   : > { %1047 = vst [vmem:[%s1649_s16 + $0x350] sm:$0xff] %v546_v14  ;;  %v609_v14 = vpop.trf.xlu2 }
 0x171   : > { %1109 = vst [vmem:[%s1649_s16 + $0x540] sm:$0xff] %v609_v14  ;;  %662 = vxpose.xlu1.b32.cont [10/16] %v252_v18, 128  ;;  %v327_v14 = vld [vmem:[%s1603_s15 + $0x4d0] sm:$0xff] }
 0x173   : > { %631 = vxpose.xlu0.b32.cont [11/16] %v259_v15, 128  ;;  %v577_v15 = vpop.trf.xlu1 }
 0x174   : > { %1077 = vst [vmem:[%s1649_s16 + $0x440] sm:$0xff] %v577_v15  ;;  %693 = vxpose.xlu2.b32.cont [9/16] %v365_v19, 128  ;;  %v320_v15 = vld [vmem:[%s1603_s15 + $0x498] sm:$0xff]  ;;  %v305_v19 = vld [vmem:[%s1603_s15 + $0x420] sm:$0xff] }
 0x177   : > { %v547_v20 = vpop.trf.xlu0 }
 0x178   : > { %1049 = vst [vmem:[%s1649_s16 + $0x360] sm:$0xff] %v547_v20  ;;  %v610_v20 = vpop.trf.xlu2 }
 0x179   : > { %1111 = vst [vmem:[%s1649_s16 + $0x550] sm:$0xff] %v610_v20  ;;  %663 = vxpose.xlu1.b32.cont [11/16] %v260_v24, 128  ;;  %v335_v20 = vld [vmem:[%s1603_s15 + $0x510] sm:$0xff] }
 0x17b   : > { %632 = vxpose.xlu0.b32.cont [12/16] %v267_v21, 128  ;;  %v578_v21 = vpop.trf.xlu1 }
 0x17c   : > { %1079 = vst [vmem:[%s1649_s16 + $0x450] sm:$0xff] %v578_v21  ;;  %694 = vxpose.xlu2.b32.cont [10/16] %v373_v25, 128  ;;  %v328_v21 = vld [vmem:[%s1603_s15 + $0x4d8] sm:$0xff]  ;;  %v313_v25 = vld [vmem:[%s1603_s15 + $0x460] sm:$0xff] }
 0x17f   : > { %v548_v26 = vpop.trf.xlu0 }
 0x180   : > { %1051 = vst [vmem:[%s1649_s16 + $0x370] sm:$0xff] %v548_v26  ;;  %v611_v26 = vpop.trf.xlu2 }
 0x181   : > { %1113 = vst [vmem:[%s1649_s16 + $0x560] sm:$0xff] %v611_v26  ;;  %664 = vxpose.xlu1.b32.cont [12/16] %v268_v30, 128  ;;  %v343_v26 = vld [vmem:[%s1603_s15 + $0x550] sm:$0xff] }
 0x183   : > { %633 = vxpose.xlu0.b32.cont [13/16] %v275_v27, 128  ;;  %v579_v27 = vpop.trf.xlu1 }
 0x184   : > { %1081 = vst [vmem:[%s1649_s16 + $0x460] sm:$0xff] %v579_v27  ;;  %695 = vxpose.xlu2.b32.cont [11/16] %v381_v31, 128  ;;  %v336_v27 = vld [vmem:[%s1603_s15 + $0x518] sm:$0xff]  ;;  %v321_v31 = vld [vmem:[%s1603_s15 + $0x4a0] sm:$0xff] }
 0x187   : > { %v549_v32 = vpop.trf.xlu0 }
 0x188   : > { %1053 = vst [vmem:[%s1649_s16 + $0x380] sm:$0xff] %v549_v32  ;;  %v612_v32 = vpop.trf.xlu2 }
 0x189   : > { %1115 = vst [vmem:[%s1649_s16 + $0x570] sm:$0xff] %v612_v32  ;;  %665 = vxpose.xlu1.b32.cont [13/16] %v276_v36, 128  ;;  %v351_v32 = vld [vmem:[%s1603_s15 + $0x590] sm:$0xff] }
 0x18b   : > { %634 = vxpose.xlu0.b32.cont [14/16] %v283_v33, 128  ;;  %v580_v33 = vpop.trf.xlu1 }
 0x18c   : > { %1083 = vst [vmem:[%s1649_s16 + $0x470] sm:$0xff] %v580_v33  ;;  %696 = vxpose.xlu2.b32.cont [12/16] %v389_v37, 128  ;;  %v344_v33 = vld [vmem:[%s1603_s15 + $0x558] sm:$0xff]  ;;  %v329_v37 = vld [vmem:[%s1603_s15 + $0x4e0] sm:$0xff] }
 0x18f   : > { %v550_v38 = vpop.trf.xlu0 }
 0x190   : > { %1055 = vst [vmem:[%s1649_s16 + $0x390] sm:$0xff] %v550_v38  ;;  %v613_v38 = vpop.trf.xlu2 }
 0x191   : > { %1117 = vst [vmem:[%s1649_s16 + $0x580] sm:$0xff] %v613_v38  ;;  %666 = vxpose.xlu1.b32.cont [14/16] %v284_v42, 128  ;;  %v359_v38 = vld [vmem:[%s1603_s15 + $0x5d0] sm:$0xff] }
 0x193   : > { %635 = vxpose.xlu0.b32.cont [15/16] %v291_v39, 128  ;;  %v581_v39 = vpop.trf.xlu1 }
 0x194   : > { %1085 = vst [vmem:[%s1649_s16 + $0x480] sm:$0xff] %v581_v39  ;;  %697 = vxpose.xlu2.b32.cont [13/16] %v397_v43, 128  ;;  %v352_v39 = vld [vmem:[%s1603_s15 + $0x598] sm:$0xff]  ;;  %v337_v43 = vld [vmem:[%s1603_s15 + $0x520] sm:$0xff] }
 0x197   : > { %v551_v44 = vpop.trf.xlu0 }
 0x198   : > { %1057 = vst [vmem:[%s1649_s16 + $0x3a0] sm:$0xff] %v551_v44  ;;  %v614_v44 = vpop.trf.xlu2 }
 0x199   : > { %1119 = vst [vmem:[%s1649_s16 + $0x590] sm:$0xff] %v614_v44  ;;  %667 = vxpose.xlu1.b32.cont [15/16] %v292_v48, 128  ;;  %v367_v44 = vld [vmem:[%s1603_s15 + $0x610] sm:$0xff] }
 0x19b   : > { %636 = vxpose.xlu0.b32.end [16/16] %v299_v45, 128  ;;  %v582_v45 = vpop.trf.xlu1 }
 0x19c   : > { %1087 = vst [vmem:[%s1649_s16 + $0x490] sm:$0xff] %v582_v45  ;;  %698 = vxpose.xlu2.b32.cont [14/16] %v405_v49, 128  ;;  %v360_v45 = vld [vmem:[%s1603_s15 + $0x5d8] sm:$0xff]  ;;  %v345_v49 = vld [vmem:[%s1603_s15 + $0x560] sm:$0xff] }
 0x19f   : > { %v552_v50 = vpop.trf.xlu0 }
 0x1a0   : > { %1059 = vst [vmem:[%s1649_s16 + $0x3b0] sm:$0xff] %v552_v50  ;;  %v615_v50 = vpop.trf.xlu2 }
 0x1a1   : > { %1121 = vst [vmem:[%s1649_s16 + $0x5a0] sm:$0xff] %v615_v50  ;;  %668 = vxpose.xlu1.b32.end [16/16] %v300_v54, 128  ;;  %v375_v50 = vld [vmem:[%s1603_s15 + $0x650] sm:$0xff] }
 0x1a3   : > { %717 = vxpose.xlu0.b32.start [1/16] %v302_v51, 128  ;;  %v583_v51 = vpop.trf.xlu1 }
 0x1a4   : > { %1089 = vst [vmem:[%s1649_s16 + $0x4a0] sm:$0xff] %v583_v51  ;;  %699 = vxpose.xlu2.b32.cont [15/16] %v413_v55, 128  ;;  %v368_v51 = vld [vmem:[%s1603_s15 + $0x618] sm:$0xff]  ;;  %v353_v55 = vld [vmem:[%s1603_s15 + $0x5a0] sm:$0xff] }
 0x1a7   : > { %v553_v56 = vpop.trf.xlu0 }
 0x1a8   : > { %1061 = vst [vmem:[%s1649_s16 + $0x3c0] sm:$0xff] %v553_v56  ;;  %v616_v56 = vpop.trf.xlu2 }
 0x1a9   : > { %1123 = vst [vmem:[%s1649_s16 + $0x5b0] sm:$0xff] %v616_v56  ;;  %749 = vxpose.xlu1.b32.start [1/16] %v303_v60, 128  ;;  %v383_v56 = vld [vmem:[%s1603_s15 + $0x690] sm:$0xff] }
 0x1ab   : > { %718 = vxpose.xlu0.b32.cont [2/16] %v310_v57, 128  ;;  %v584_v57 = vpop.trf.xlu1 }
 0x1ac   : > { %1091 = vst [vmem:[%s1649_s16 + $0x4b0] sm:$0xff] %v584_v57  ;;  %700 = vxpose.xlu2.b32.end [16/16] %v421_v61, 128  ;;  %v376_v57 = vld [vmem:[%s1603_s15 + $0x658] sm:$0xff]  ;;  %v361_v61 = vld [vmem:[%s1603_s15 + $0x5e0] sm:$0xff] }
 0x1af   : > { %v554_v62 = vpop.trf.xlu0 }
 0x1b0   : > { %1063 = vst [vmem:[%s1649_s16 + $0x3d0] sm:$0xff] %v554_v62  ;;  %v617_v62 = vpop.trf.xlu2 }
 0x1b1   : > { %1125 = vst [vmem:[%s1649_s16 + $0x5c0] sm:$0xff] %v617_v62  ;;  %750 = vxpose.xlu1.b32.cont [2/16] %v311_v2, 128  ;;  %v391_v62 = vld [vmem:[%s1603_s15 + $0x6d0] sm:$0xff] }
 0x1b3   : > { %719 = vxpose.xlu0.b32.cont [3/16] %v318_v63, 128  ;;  %v585_v63 = vpop.trf.xlu1 }
 0x1b4   : > { %1093 = vst [vmem:[%s1649_s16 + $0x4c0] sm:$0xff] %v585_v63  ;;  %781 = vxpose.xlu2.b32.start [1/16] %v304_v3, 128  ;;  %v384_v63 = vld [vmem:[%s1603_s15 + $0x698] sm:$0xff]  ;;  %v369_v3 = vld [vmem:[%s1603_s15 + $0x620] sm:$0xff] }
 0x1b7   : > { %v555_v4 = vpop.trf.xlu0 }
 0x1b8   : > { %1065 = vst [vmem:[%s1649_s16 + $0x3e0] sm:$0xff] %v555_v4  ;;  %v618_v4 = vpop.trf.xlu2 }
 0x1b9   : > { %1127 = vst [vmem:[%s1649_s16 + $0x5d0] sm:$0xff] %v618_v4  ;;  %751 = vxpose.xlu1.b32.cont [3/16] %v319_v8, 128  ;;  %v399_v4 = vld [vmem:[%s1603_s15 + $0x710] sm:$0xff] }
 0x1bb   : > { %720 = vxpose.xlu0.b32.cont [4/16] %v326_v5, 128  ;;  %v586_v5 = vpop.trf.xlu1 }
 0x1bc   : > { %1095 = vst [vmem:[%s1649_s16 + $0x4d0] sm:$0xff] %v586_v5  ;;  %782 = vxpose.xlu2.b32.cont [2/16] %v312_v9, 128  ;;  %v392_v5 = vld [vmem:[%s1603_s15 + $0x6d8] sm:$0xff]  ;;  %v377_v9 = vld [vmem:[%s1603_s15 + $0x660] sm:$0xff] }
 0x1bf   : > { %v556_v10 = vpop.trf.xlu0 }
 0x1c0   : > { %1067 = vst [vmem:[%s1649_s16 + $0x3f0] sm:$0xff] %v556_v10  ;;  %v619_v10 = vpop.trf.xlu2 }
 0x1c1   : > { %1129 = vst [vmem:[%s1649_s16 + $0x5e0] sm:$0xff] %v619_v10  ;;  %752 = vxpose.xlu1.b32.cont [4/16] %v327_v14, 128  ;;  %v407_v10 = vld [vmem:[%s1603_s15 + $0x750] sm:$0xff] }
 0x1c3   : > { %721 = vxpose.xlu0.b32.cont [5/16] %v334_v11, 128  ;;  %v587_v11 = vpop.trf.xlu1 }
 0x1c4   : > { %1097 = vst [vmem:[%s1649_s16 + $0x4e0] sm:$0xff] %v587_v11  ;;  %783 = vxpose.xlu2.b32.cont [3/16] %v320_v15, 128  ;;  %v400_v11 = vld [vmem:[%s1603_s15 + $0x718] sm:$0xff]  ;;  %v385_v15 = vld [vmem:[%s1603_s15 + $0x6a0] sm:$0xff] }
 0x1c7   : > { %v637_v16 = vpop.trf.xlu0 }
 0x1c8   : > { %1133 = vst [vmem:[%s1649_s16 + $0x600] sm:$0xff] %v637_v16  ;;  %v620_v16 = vpop.trf.xlu2 }
 0x1c9   : > { %1131 = vst [vmem:[%s1649_s16 + $0x5f0] sm:$0xff] %v620_v16  ;;  %753 = vxpose.xlu1.b32.cont [5/16] %v335_v20, 128  ;;  %v415_v16 = vld [vmem:[%s1603_s15 + $0x790] sm:$0xff] }
 0x1cb   : > { %722 = vxpose.xlu0.b32.cont [6/16] %v342_v17, 128  ;;  %v588_v17 = vpop.trf.xlu1 }
 0x1cc   : > { %1099 = vst [vmem:[%s1649_s16 + $0x4f0] sm:$0xff] %v588_v17  ;;  %784 = vxpose.xlu2.b32.cont [4/16] %v328_v21, 128  ;;  %v408_v17 = vld [vmem:[%s1603_s15 + $0x758] sm:$0xff]  ;;  %v393_v21 = vld [vmem:[%s1603_s15 + $0x6e0] sm:$0xff] }
 0x1cf   : > { %v638_v22 = vpop.trf.xlu0 }
 0x1d0   : > { %1135 = vst [vmem:[%s1649_s16 + $0x610] sm:$0xff] %v638_v22  ;;  %v701_v22 = vpop.trf.xlu2 }
 0x1d1   : > { %942 = vst [vmem:[%s1649_s16 + $0x8] sm:$0xff] %v701_v22  ;;  %754 = vxpose.xlu1.b32.cont [6/16] %v343_v26, 128  ;;  %v423_v22 = vld [vmem:[%s1603_s15 + $0x7d0] sm:$0xff] }
 0x1d3   : > { %723 = vxpose.xlu0.b32.cont [7/16] %v350_v23, 128  ;;  %v669_v23 = vpop.trf.xlu1 }
 0x1d4   : > { %1165 = vst [vmem:[%s1649_s16 + $0x700] sm:$0xff] %v669_v23  ;;  %785 = vxpose.xlu2.b32.cont [5/16] %v336_v27, 128  ;;  %v416_v23 = vld [vmem:[%s1603_s15 + $0x798] sm:$0xff]  ;;  %v401_v27 = vld [vmem:[%s1603_s15 + $0x720] sm:$0xff] }
 0x1d7   : > { %v639_v28 = vpop.trf.xlu0 }
 0x1d8   : > { %1137 = vst [vmem:[%s1649_s16 + $0x620] sm:$0xff] %v639_v28  ;;  %v702_v28 = vpop.trf.xlu2 }
 0x1d9   : > { %944 = vst [vmem:[%s1649_s16 + $0x18] sm:$0xff] %v702_v28  ;;  %755 = vxpose.xlu1.b32.cont [7/16] %v351_v32, 128  ;;  %v306_v28 = vld [vmem:[%s1603_s15 + $0x428] sm:$0xff] }
 0x1db   : > { %724 = vxpose.xlu0.b32.cont [8/16] %v358_v29, 128  ;;  %v670_v29 = vpop.trf.xlu1 }
 0x1dc   : > { %1167 = vst [vmem:[%s1649_s16 + $0x710] sm:$0xff] %v670_v29  ;;  %786 = vxpose.xlu2.b32.cont [6/16] %v344_v33, 128  ;;  %v424_v29 = vld [vmem:[%s1603_s15 + $0x7d8] sm:$0xff]  ;;  %v409_v33 = vld [vmem:[%s1603_s15 + $0x760] sm:$0xff] }
 0x1df   : > { %v640_v34 = vpop.trf.xlu0 }
 0x1e0   : > { %1139 = vst [vmem:[%s1649_s16 + $0x630] sm:$0xff] %v640_v34  ;;  %v703_v34 = vpop.trf.xlu2 }
 0x1e1   : > { %946 = vst [vmem:[%s1649_s16 + $0x28] sm:$0xff] %v703_v34  ;;  %756 = vxpose.xlu1.b32.cont [8/16] %v359_v38, 128  ;;  %v314_v34 = vld [vmem:[%s1603_s15 + $0x468] sm:$0xff] }
 0x1e3   : > { %725 = vxpose.xlu0.b32.cont [9/16] %v366_v35, 128  ;;  %v671_v35 = vpop.trf.xlu1 }
 0x1e4   : > { %1169 = vst [vmem:[%s1649_s16 + $0x720] sm:$0xff] %v671_v35  ;;  %787 = vxpose.xlu2.b32.cont [7/16] %v352_v39, 128  ;;  %v307_v35 = vld [vmem:[%s1603_s15 + $0x430] sm:$0xff]  ;;  %v417_v39 = vld [vmem:[%s1603_s15 + $0x7a0] sm:$0xff] }
 0x1e7   : > { %v641_v40 = vpop.trf.xlu0 }
 0x1e8   : > { %1141 = vst [vmem:[%s1649_s16 + $0x640] sm:$0xff] %v641_v40  ;;  %v704_v40 = vpop.trf.xlu2 }
 0x1e9   : > { %948 = vst [vmem:[%s1649_s16 + $0x38] sm:$0xff] %v704_v40  ;;  %757 = vxpose.xlu1.b32.cont [9/16] %v367_v44, 128  ;;  %v322_v40 = vld [vmem:[%s1603_s15 + $0x4a8] sm:$0xff] }
 0x1eb   : > { %726 = vxpose.xlu0.b32.cont [10/16] %v374_v41, 128  ;;  %v672_v41 = vpop.trf.xlu1 }
 0x1ec   : > { %1171 = vst [vmem:[%s1649_s16 + $0x730] sm:$0xff] %v672_v41  ;;  %788 = vxpose.xlu2.b32.cont [8/16] %v360_v45, 128  ;;  %v315_v41 = vld [vmem:[%s1603_s15 + $0x470] sm:$0xff]  ;;  %v425_v45 = vld [vmem:[%s1603_s15 + $0x7e0] sm:$0xff] }
 0x1ef   : > { %v642_v46 = vpop.trf.xlu0 }
 0x1f0   : > { %1143 = vst [vmem:[%s1649_s16 + $0x650] sm:$0xff] %v642_v46  ;;  %v705_v46 = vpop.trf.xlu2 }
 0x1f1   : > { %950 = vst [vmem:[%s1649_s16 + $0x48] sm:$0xff] %v705_v46  ;;  %758 = vxpose.xlu1.b32.cont [10/16] %v375_v50, 128  ;;  %v330_v46 = vld [vmem:[%s1603_s15 + $0x4e8] sm:$0xff] }
 0x1f3   : > { %727 = vxpose.xlu0.b32.cont [11/16] %v382_v47, 128  ;;  %v673_v47 = vpop.trf.xlu1 }
 0x1f4   : > { %1173 = vst [vmem:[%s1649_s16 + $0x740] sm:$0xff] %v673_v47  ;;  %789 = vxpose.xlu2.b32.cont [9/16] %v368_v51, 128  ;;  %v323_v47 = vld [vmem:[%s1603_s15 + $0x4b0] sm:$0xff]  ;;  %v308_v51 = vld [vmem:[%s1603_s15 + $0x438] sm:$0xff] }
 0x1f7   : > { %v643_v52 = vpop.trf.xlu0 }
 0x1f8   : > { %1145 = vst [vmem:[%s1649_s16 + $0x660] sm:$0xff] %v643_v52  ;;  %v706_v52 = vpop.trf.xlu2 }
 0x1f9   : > { %952 = vst [vmem:[%s1649_s16 + $0x58] sm:$0xff] %v706_v52  ;;  %759 = vxpose.xlu1.b32.cont [11/16] %v383_v56, 128  ;;  %v338_v52 = vld [vmem:[%s1603_s15 + $0x528] sm:$0xff] }
 0x1fb   : > { %728 = vxpose.xlu0.b32.cont [12/16] %v390_v53, 128  ;;  %v674_v53 = vpop.trf.xlu1 }
 0x1fc   : > { %1175 = vst [vmem:[%s1649_s16 + $0x750] sm:$0xff] %v674_v53  ;;  %790 = vxpose.xlu2.b32.cont [10/16] %v376_v57, 128  ;;  %v331_v53 = vld [vmem:[%s1603_s15 + $0x4f0] sm:$0xff]  ;;  %v316_v57 = vld [vmem:[%s1603_s15 + $0x478] sm:$0xff] }
 0x1ff   : > { %v644_v58 = vpop.trf.xlu0 }
 0x200   : > { %1147 = vst [vmem:[%s1649_s16 + $0x670] sm:$0xff] %v644_v58  ;;  %v707_v58 = vpop.trf.xlu2 }
 0x201   : > { %954 = vst [vmem:[%s1649_s16 + $0x68] sm:$0xff] %v707_v58  ;;  %760 = vxpose.xlu1.b32.cont [12/16] %v391_v62, 128  ;;  %v346_v58 = vld [vmem:[%s1603_s15 + $0x568] sm:$0xff] }
 0x203   : > { %729 = vxpose.xlu0.b32.cont [13/16] %v398_v59, 128  ;;  %v675_v59 = vpop.trf.xlu1 }
 0x204   : > { %1177 = vst [vmem:[%s1649_s16 + $0x760] sm:$0xff] %v675_v59  ;;  %791 = vxpose.xlu2.b32.cont [11/16] %v384_v63, 128  ;;  %v339_v59 = vld [vmem:[%s1603_s15 + $0x530] sm:$0xff]  ;;  %v324_v63 = vld [vmem:[%s1603_s15 + $0x4b8] sm:$0xff] }
 0x207   : > { %v645_v0 = vpop.trf.xlu0 }
 0x208   : > { %1149 = vst [vmem:[%s1649_s16 + $0x680] sm:$0xff] %v645_v0  ;;  %v708_v0 = vpop.trf.xlu2 }
 0x209   : > { %956 = vst [vmem:[%s1649_s16 + $0x78] sm:$0xff] %v708_v0  ;;  %761 = vxpose.xlu1.b32.cont [13/16] %v399_v4, 128  ;;  %v354_v0 = vld [vmem:[%s1603_s15 + $0x5a8] sm:$0xff] }
 0x20b   : > { %730 = vxpose.xlu0.b32.cont [14/16] %v406_v1, 128  ;;  %v676_v1 = vpop.trf.xlu1 }
 0x20c   : > { %1179 = vst [vmem:[%s1649_s16 + $0x770] sm:$0xff] %v676_v1  ;;  %792 = vxpose.xlu2.b32.cont [12/16] %v392_v5, 128  ;;  %v347_v1 = vld [vmem:[%s1603_s15 + $0x570] sm:$0xff]  ;;  %v332_v5 = vld [vmem:[%s1603_s15 + $0x4f8] sm:$0xff] }
 0x20f   : > { %v646_v6 = vpop.trf.xlu0 }
 0x210   : > { %1151 = vst [vmem:[%s1649_s16 + $0x690] sm:$0xff] %v646_v6  ;;  %v709_v6 = vpop.trf.xlu2 }
 0x211   : > { %958 = vst [vmem:[%s1649_s16 + $0x88] sm:$0xff] %v709_v6  ;;  %762 = vxpose.xlu1.b32.cont [14/16] %v407_v10, 128  ;;  %v362_v6 = vld [vmem:[%s1603_s15 + $0x5e8] sm:$0xff] }
 0x213   : > { %731 = vxpose.xlu0.b32.cont [15/16] %v414_v7, 128  ;;  %v677_v7 = vpop.trf.xlu1 }
 0x214   : > { %1181 = vst [vmem:[%s1649_s16 + $0x780] sm:$0xff] %v677_v7  ;;  %793 = vxpose.xlu2.b32.cont [13/16] %v400_v11, 128  ;;  %v355_v7 = vld [vmem:[%s1603_s15 + $0x5b0] sm:$0xff]  ;;  %v340_v11 = vld [vmem:[%s1603_s15 + $0x538] sm:$0xff] }
 0x217   : > { %v647_v12 = vpop.trf.xlu0 }
 0x218   : > { %1153 = vst [vmem:[%s1649_s16 + $0x6a0] sm:$0xff] %v647_v12  ;;  %v710_v12 = vpop.trf.xlu2 }
 0x219   : > { %960 = vst [vmem:[%s1649_s16 + $0x98] sm:$0xff] %v710_v12  ;;  %763 = vxpose.xlu1.b32.cont [15/16] %v415_v16, 128  ;;  %v370_v12 = vld [vmem:[%s1603_s15 + $0x628] sm:$0xff] }
 0x21b   : > { %732 = vxpose.xlu0.b32.end [16/16] %v422_v13, 128  ;;  %v678_v13 = vpop.trf.xlu1 }
 0x21c   : > { %1183 = vst [vmem:[%s1649_s16 + $0x790] sm:$0xff] %v678_v13  ;;  %794 = vxpose.xlu2.b32.cont [14/16] %v408_v17, 128  ;;  %v363_v13 = vld [vmem:[%s1603_s15 + $0x5f0] sm:$0xff]  ;;  %v348_v17 = vld [vmem:[%s1603_s15 + $0x578] sm:$0xff] }
 0x21f   : > { %v648_v18 = vpop.trf.xlu0 }
 0x220   : > { %1155 = vst [vmem:[%s1649_s16 + $0x6b0] sm:$0xff] %v648_v18  ;;  %v711_v18 = vpop.trf.xlu2 }
 0x221   : > { %962 = vst [vmem:[%s1649_s16 + $0xa8] sm:$0xff] %v711_v18  ;;  %764 = vxpose.xlu1.b32.end [16/16] %v423_v22, 128  ;;  %v378_v18 = vld [vmem:[%s1603_s15 + $0x668] sm:$0xff] }
 0x223   : > { %813 = vxpose.xlu0.b32.start [1/16] %v305_v19, 128  ;;  %v679_v19 = vpop.trf.xlu1 }
 0x224   : > { %1185 = vst [vmem:[%s1649_s16 + $0x7a0] sm:$0xff] %v679_v19  ;;  %795 = vxpose.xlu2.b32.cont [15/16] %v416_v23, 128  ;;  %v371_v19 = vld [vmem:[%s1603_s15 + $0x630] sm:$0xff]  ;;  %v356_v23 = vld [vmem:[%s1603_s15 + $0x5b8] sm:$0xff] }
 0x227   : > { %v649_v24 = vpop.trf.xlu0 }
 0x228   : > { %1157 = vst [vmem:[%s1649_s16 + $0x6c0] sm:$0xff] %v649_v24  ;;  %v712_v24 = vpop.trf.xlu2 }
 0x229   : > { %964 = vst [vmem:[%s1649_s16 + $0xb8] sm:$0xff] %v712_v24  ;;  %845 = vxpose.xlu1.b32.start [1/16] %v306_v28, 128  ;;  %v386_v24 = vld [vmem:[%s1603_s15 + $0x6a8] sm:$0xff] }
 0x22b   : > { %814 = vxpose.xlu0.b32.cont [2/16] %v313_v25, 128  ;;  %v680_v25 = vpop.trf.xlu1 }
 0x22c   : > { %1187 = vst [vmem:[%s1649_s16 + $0x7b0] sm:$0xff] %v680_v25  ;;  %796 = vxpose.xlu2.b32.end [16/16] %v424_v29, 128  ;;  %v379_v25 = vld [vmem:[%s1603_s15 + $0x670] sm:$0xff]  ;;  %v364_v29 = vld [vmem:[%s1603_s15 + $0x5f8] sm:$0xff] }
 0x22f   : > { %v650_v30 = vpop.trf.xlu0 }
 0x230   : > { %1159 = vst [vmem:[%s1649_s16 + $0x6d0] sm:$0xff] %v650_v30  ;;  %v713_v30 = vpop.trf.xlu2 }
 0x231   : > { %966 = vst [vmem:[%s1649_s16 + $0xc8] sm:$0xff] %v713_v30  ;;  %846 = vxpose.xlu1.b32.cont [2/16] %v314_v34, 128  ;;  %v394_v30 = vld [vmem:[%s1603_s15 + $0x6e8] sm:$0xff] }
 0x233   : > { %815 = vxpose.xlu0.b32.cont [3/16] %v321_v31, 128  ;;  %v681_v31 = vpop.trf.xlu1 }
 0x234   : > { %1189 = vst [vmem:[%s1649_s16 + $0x7c0] sm:$0xff] %v681_v31  ;;  %877 = vxpose.xlu2.b32.start [1/16] %v307_v35, 128  ;;  %v387_v31 = vld [vmem:[%s1603_s15 + $0x6b0] sm:$0xff]  ;;  %v372_v35 = vld [vmem:[%s1603_s15 + $0x638] sm:$0xff] }
 0x237   : > { %v651_v36 = vpop.trf.xlu0 }
 0x238   : > { %1161 = vst [vmem:[%s1649_s16 + $0x6e0] sm:$0xff] %v651_v36  ;;  %v714_v36 = vpop.trf.xlu2 }
 0x239   : > { %968 = vst [vmem:[%s1649_s16 + $0xd8] sm:$0xff] %v714_v36  ;;  %847 = vxpose.xlu1.b32.cont [3/16] %v322_v40, 128  ;;  %v402_v36 = vld [vmem:[%s1603_s15 + $0x728] sm:$0xff] }
 0x23b   : > { %816 = vxpose.xlu0.b32.cont [4/16] %v329_v37, 128  ;;  %v682_v37 = vpop.trf.xlu1 }
 0x23c   : > { %1191 = vst [vmem:[%s1649_s16 + $0x7d0] sm:$0xff] %v682_v37  ;;  %878 = vxpose.xlu2.b32.cont [2/16] %v315_v41, 128  ;;  %v395_v37 = vld [vmem:[%s1603_s15 + $0x6f0] sm:$0xff]  ;;  %v380_v41 = vld [vmem:[%s1603_s15 + $0x678] sm:$0xff] }
 0x23f   : > { %v652_v42 = vpop.trf.xlu0 }
 0x240   : > { %1163 = vst [vmem:[%s1649_s16 + $0x6f0] sm:$0xff] %v652_v42  ;;  %v715_v42 = vpop.trf.xlu2 }
 0x241   : > { %970 = vst [vmem:[%s1649_s16 + $0xe8] sm:$0xff] %v715_v42  ;;  %848 = vxpose.xlu1.b32.cont [4/16] %v330_v46, 128  ;;  %v410_v42 = vld [vmem:[%s1603_s15 + $0x768] sm:$0xff] }
 0x243   : > { %817 = vxpose.xlu0.b32.cont [5/16] %v337_v43, 128  ;;  %v683_v43 = vpop.trf.xlu1 }
 0x244   : > { %1193 = vst [vmem:[%s1649_s16 + $0x7e0] sm:$0xff] %v683_v43  ;;  %879 = vxpose.xlu2.b32.cont [3/16] %v323_v47, 128  ;;  %v403_v43 = vld [vmem:[%s1603_s15 + $0x730] sm:$0xff]  ;;  %v388_v47 = vld [vmem:[%s1603_s15 + $0x6b8] sm:$0xff] }
 0x247   : > { %v733_v48 = vpop.trf.xlu0 }
 0x248   : > { %974 = vst [vmem:[%s1649_s16 + $0x108] sm:$0xff] %v733_v48  ;;  %v716_v48 = vpop.trf.xlu2 }
 0x249   : > { %972 = vst [vmem:[%s1649_s16 + $0xf8] sm:$0xff] %v716_v48  ;;  %849 = vxpose.xlu1.b32.cont [5/16] %v338_v52, 128  ;;  %v418_v48 = vld [vmem:[%s1603_s15 + $0x7a8] sm:$0xff] }
 0x24b   : > { %818 = vxpose.xlu0.b32.cont [6/16] %v345_v49, 128  ;;  %v684_v49 = vpop.trf.xlu1 }
 0x24c   : > { %1195 = vst [vmem:[%s1649_s16 + $0x7f0] sm:$0xff] %v684_v49  ;;  %880 = vxpose.xlu2.b32.cont [4/16] %v331_v53, 128  ;;  %v411_v49 = vld [vmem:[%s1603_s15 + $0x770] sm:$0xff]  ;;  %v396_v53 = vld [vmem:[%s1603_s15 + $0x6f8] sm:$0xff] }
 0x24f   : > { %v734_v54 = vpop.trf.xlu0 }
 0x250   : > { %976 = vst [vmem:[%s1649_s16 + $0x118] sm:$0xff] %v734_v54  ;;  %v797_v54 = vpop.trf.xlu2 }
 0x251   : > { %1038 = vst [vmem:[%s1649_s16 + $0x308] sm:$0xff] %v797_v54  ;;  %850 = vxpose.xlu1.b32.cont [6/16] %v346_v58, 128  ;;  %v426_v54 = vld [vmem:[%s1603_s15 + $0x7e8] sm:$0xff] }
 0x253   : > { %819 = vxpose.xlu0.b32.cont [7/16] %v353_v55, 128  ;;  %v765_v55 = vpop.trf.xlu1 }
 0x254   : > { %1006 = vst [vmem:[%s1649_s16 + $0x208] sm:$0xff] %v765_v55  ;;  %881 = vxpose.xlu2.b32.cont [5/16] %v339_v59, 128  ;;  %v419_v55 = vld [vmem:[%s1603_s15 + $0x7b0] sm:$0xff]  ;;  %v404_v59 = vld [vmem:[%s1603_s15 + $0x738] sm:$0xff] }
 0x257   : > { %v735_v60 = vpop.trf.xlu0 }
 0x258   : > { %978 = vst [vmem:[%s1649_s16 + $0x128] sm:$0xff] %v735_v60  ;;  %v798_v60 = vpop.trf.xlu2 }
 0x259   : > { %1040 = vst [vmem:[%s1649_s16 + $0x318] sm:$0xff] %v798_v60  ;;  %851 = vxpose.xlu1.b32.cont [7/16] %v354_v0, 128  ;;  %v427_v60 = vld [vmem:[%s1603_s15 + $0x7f0] sm:$0xff]  ;;  %v412_v0 = vld [vmem:[%s1603_s15 + $0x778] sm:$0xff] }
 0x25b   : > { %820 = vxpose.xlu0.b32.cont [8/16] %v361_v61, 128  ;;  %v766_v61 = vpop.trf.xlu1 }
 0x25c   : > { %1008 = vst [vmem:[%s1649_s16 + $0x218] sm:$0xff] %v766_v61  ;;  %882 = vxpose.xlu2.b32.cont [6/16] %v347_v1, 128 }
 0x25f   : > { %v736_v2 = vpop.trf.xlu0 }
 0x260   : > { %980 = vst [vmem:[%s1649_s16 + $0x138] sm:$0xff] %v736_v2  ;;  %v799_v2 = vpop.trf.xlu2 }
 0x261   : > { %1042 = vst [vmem:[%s1649_s16 + $0x328] sm:$0xff] %v799_v2  ;;  %852 = vxpose.xlu1.b32.cont [8/16] %v362_v6, 128 }
 0x263   : > { %821 = vxpose.xlu0.b32.cont [9/16] %v369_v3, 128  ;;  %v767_v3 = vpop.trf.xlu1 }
 0x264   : > { %1010 = vst [vmem:[%s1649_s16 + $0x228] sm:$0xff] %v767_v3  ;;  %883 = vxpose.xlu2.b32.cont [7/16] %v355_v7, 128 }
 0x267   : > { %v737_v8 = vpop.trf.xlu0 }
 0x268   : > { %982 = vst [vmem:[%s1649_s16 + $0x148] sm:$0xff] %v737_v8  ;;  %v800_v8 = vpop.trf.xlu2 }
 0x269   : > { %1044 = vst [vmem:[%s1649_s16 + $0x338] sm:$0xff] %v800_v8  ;;  %853 = vxpose.xlu1.b32.cont [9/16] %v370_v12, 128  ;;  %v428_v8 = vld [vmem:[%s1603_s15 + $0x7f8] sm:$0xff] }
 0x26b   : > { %822 = vxpose.xlu0.b32.cont [10/16] %v377_v9, 128  ;;  %v768_v9 = vpop.trf.xlu1 }
 0x26c   : > { %1012 = vst [vmem:[%s1649_s16 + $0x238] sm:$0xff] %v768_v9  ;;  %884 = vxpose.xlu2.b32.cont [8/16] %v363_v13, 128 }
 0x26f   : > { %v738_v14 = vpop.trf.xlu0 }
 0x270   : > { %984 = vst [vmem:[%s1649_s16 + $0x158] sm:$0xff] %v738_v14  ;;  %v801_v14 = vpop.trf.xlu2 }
 0x271   : > { %1046 = vst [vmem:[%s1649_s16 + $0x348] sm:$0xff] %v801_v14  ;;  %854 = vxpose.xlu1.b32.cont [10/16] %v378_v18, 128 }
 0x273   : > { %823 = vxpose.xlu0.b32.cont [11/16] %v385_v15, 128  ;;  %v769_v15 = vpop.trf.xlu1 }
 0x274   : > { %1014 = vst [vmem:[%s1649_s16 + $0x248] sm:$0xff] %v769_v15  ;;  %885 = vxpose.xlu2.b32.cont [9/16] %v371_v19, 128 }
 0x277   : > { %v739_v20 = vpop.trf.xlu0 }
 0x278   : > { %986 = vst [vmem:[%s1649_s16 + $0x168] sm:$0xff] %v739_v20  ;;  %v802_v20 = vpop.trf.xlu2 }
 0x279   : > { %1048 = vst [vmem:[%s1649_s16 + $0x358] sm:$0xff] %v802_v20  ;;  %855 = vxpose.xlu1.b32.cont [11/16] %v386_v24, 128 }
 0x27b   : > { %824 = vxpose.xlu0.b32.cont [12/16] %v393_v21, 128  ;;  %v770_v21 = vpop.trf.xlu1 }
 0x27c   : > { %1016 = vst [vmem:[%s1649_s16 + $0x258] sm:$0xff] %v770_v21  ;;  %886 = vxpose.xlu2.b32.cont [10/16] %v379_v25, 128 }
 0x27f   : > { %v740_v26 = vpop.trf.xlu0 }
 0x280   : > { %988 = vst [vmem:[%s1649_s16 + $0x178] sm:$0xff] %v740_v26  ;;  %v803_v26 = vpop.trf.xlu2 }
 0x281   : > { %1050 = vst [vmem:[%s1649_s16 + $0x368] sm:$0xff] %v803_v26  ;;  %856 = vxpose.xlu1.b32.cont [12/16] %v394_v30, 128 }
 0x283   : > { %825 = vxpose.xlu0.b32.cont [13/16] %v401_v27, 128  ;;  %v771_v27 = vpop.trf.xlu1 }
 0x284   : > { %1018 = vst [vmem:[%s1649_s16 + $0x268] sm:$0xff] %v771_v27  ;;  %887 = vxpose.xlu2.b32.cont [11/16] %v387_v31, 128 }
 0x287   : > { %v741_v32 = vpop.trf.xlu0 }
 0x288   : > { %990 = vst [vmem:[%s1649_s16 + $0x188] sm:$0xff] %v741_v32  ;;  %v804_v32 = vpop.trf.xlu2 }
 0x289   : > { %1052 = vst [vmem:[%s1649_s16 + $0x378] sm:$0xff] %v804_v32  ;;  %857 = vxpose.xlu1.b32.cont [13/16] %v402_v36, 128 }
 0x28b   : > { %826 = vxpose.xlu0.b32.cont [14/16] %v409_v33, 128  ;;  %v772_v33 = vpop.trf.xlu1 }
 0x28c   : > { %1020 = vst [vmem:[%s1649_s16 + $0x278] sm:$0xff] %v772_v33  ;;  %888 = vxpose.xlu2.b32.cont [12/16] %v395_v37, 128 }
 0x28f   : > { %v742_v38 = vpop.trf.xlu0 }
 0x290   : > { %992 = vst [vmem:[%s1649_s16 + $0x198] sm:$0xff] %v742_v38  ;;  %v805_v38 = vpop.trf.xlu2 }
 0x291   : > { %1054 = vst [vmem:[%s1649_s16 + $0x388] sm:$0xff] %v805_v38  ;;  %858 = vxpose.xlu1.b32.cont [14/16] %v410_v42, 128 }
 0x293   : > { %827 = vxpose.xlu0.b32.cont [15/16] %v417_v39, 128  ;;  %v773_v39 = vpop.trf.xlu1 }
 0x294   : > { %1022 = vst [vmem:[%s1649_s16 + $0x288] sm:$0xff] %v773_v39  ;;  %889 = vxpose.xlu2.b32.cont [13/16] %v403_v43, 128 }
 0x297   : > { %v743_v44 = vpop.trf.xlu0 }
 0x298   : > { %994 = vst [vmem:[%s1649_s16 + $0x1a8] sm:$0xff] %v743_v44  ;;  %v806_v44 = vpop.trf.xlu2 }
 0x299   : > { %1056 = vst [vmem:[%s1649_s16 + $0x398] sm:$0xff] %v806_v44  ;;  %859 = vxpose.xlu1.b32.cont [15/16] %v418_v48, 128 }
 0x29b   : > { %828 = vxpose.xlu0.b32.end [16/16] %v425_v45, 128  ;;  %v774_v45 = vpop.trf.xlu1 }
 0x29c   : > { %1024 = vst [vmem:[%s1649_s16 + $0x298] sm:$0xff] %v774_v45  ;;  %890 = vxpose.xlu2.b32.cont [14/16] %v411_v49, 128 }
 0x29f   : > { %v744_v50 = vpop.trf.xlu0 }
 0x2a0   : > { %996 = vst [vmem:[%s1649_s16 + $0x1b8] sm:$0xff] %v744_v50  ;;  %v807_v50 = vpop.trf.xlu2 }
 0x2a1   : > { %1058 = vst [vmem:[%s1649_s16 + $0x3a8] sm:$0xff] %v807_v50  ;;  %860 = vxpose.xlu1.b32.end [16/16] %v426_v54, 128 }
 0x2a3   : > { %909 = vxpose.xlu0.b32.start [1/16] %v308_v51, 128  ;;  %v775_v51 = vpop.trf.xlu1 }
 0x2a4   : > { %1026 = vst [vmem:[%s1649_s16 + $0x2a8] sm:$0xff] %v775_v51  ;;  %891 = vxpose.xlu2.b32.cont [15/16] %v419_v55, 128 }
 0x2a7   : > { %v745_v56 = vpop.trf.xlu0 }
 0x2a8   : > { %998 = vst [vmem:[%s1649_s16 + $0x1c8] sm:$0xff] %v745_v56  ;;  %v808_v56 = vpop.trf.xlu2 }
 0x2a9   : > { %1060 = vst [vmem:[%s1649_s16 + $0x3b8] sm:$0xff] %v808_v56 }
 0x2ab   : > { %910 = vxpose.xlu0.b32.cont [2/16] %v316_v57, 128  ;;  %v776_v57 = vpop.trf.xlu1 }
 0x2ac   : > { %1028 = vst [vmem:[%s1649_s16 + $0x2b8] sm:$0xff] %v776_v57  ;;  %892 = vxpose.xlu2.b32.end [16/16] %v427_v60, 128 }
 0x2af   : > { %v746_v62 = vpop.trf.xlu0 }
 0x2b0   : > { %1000 = vst [vmem:[%s1649_s16 + $0x1d8] sm:$0xff] %v746_v62  ;;  %v809_v61 = vpop.trf.xlu2 }
 0x2b1   : > { %1062 = vst [vmem:[%s1649_s16 + $0x3c8] sm:$0xff] %v809_v61 }
 0x2b3   : > { %911 = vxpose.xlu0.b32.cont [3/16] %v324_v63, 128  ;;  %v777_v62 = vpop.trf.xlu1 }
 0x2b4   : > { %1030 = vst [vmem:[%s1649_s16 + $0x2c8] sm:$0xff] %v777_v62 }
 0x2b7   : > { %v747_v4 = vpop.trf.xlu0 }
 0x2b8   : > { %1002 = vst [vmem:[%s1649_s16 + $0x1e8] sm:$0xff] %v747_v4  ;;  %v810_v1 = vpop.trf.xlu2  ;;  %v420_v4 = vld [vmem:[%s1603_s15 + $0x7b8] sm:$0xff] }
 0x2b9   : > { %1064 = vst [vmem:[%s1649_s16 + $0x3d8] sm:$0xff] %v810_v1 }
 0x2bb   : > { %912 = vxpose.xlu0.b32.cont [4/16] %v332_v5, 128  ;;  %v778_v2 = vpop.trf.xlu1 }
 0x2bc   : > { %1032 = vst [vmem:[%s1649_s16 + $0x2d8] sm:$0xff] %v778_v2 }
 0x2bf   : > { %v748_v10 = vpop.trf.xlu0 }
 0x2c0   : > { %1004 = vst [vmem:[%s1649_s16 + $0x1f8] sm:$0xff] %v748_v10  ;;  %v811_v5 = vpop.trf.xlu2 }
 0x2c1   : > { %1066 = vst [vmem:[%s1649_s16 + $0x3e8] sm:$0xff] %v811_v5 }
 0x2c3   : > { %913 = vxpose.xlu0.b32.cont [5/16] %v340_v11, 128  ;;  %v779_v6 = vpop.trf.xlu1 }
 0x2c4   : > { %1034 = vst [vmem:[%s1649_s16 + $0x2e8] sm:$0xff] %v779_v6 }
 0x2c7   : > { %v829_v16 = vpop.trf.xlu0 }
 0x2c8   : > { %1070 = vst [vmem:[%s1649_s16 + $0x408] sm:$0xff] %v829_v16  ;;  %v812_v9 = vpop.trf.xlu2 }
 0x2c9   : > { %1068 = vst [vmem:[%s1649_s16 + $0x3f8] sm:$0xff] %v812_v9 }
 0x2cb   : > { %914 = vxpose.xlu0.b32.cont [6/16] %v348_v17, 128  ;;  %v780_v10 = vpop.trf.xlu1 }
 0x2cc   : > { %1036 = vst [vmem:[%s1649_s16 + $0x2f8] sm:$0xff] %v780_v10 }
 0x2cf   : > { %v830_v22 = vpop.trf.xlu0 }
 0x2d0   : > { %1072 = vst [vmem:[%s1649_s16 + $0x418] sm:$0xff] %v830_v22  ;;  %v893_v12 = vpop.trf.xlu2 }
 0x2d1   : > { %1134 = vst [vmem:[%s1649_s16 + $0x608] sm:$0xff] %v893_v12 }
 0x2d3   : > { %915 = vxpose.xlu0.b32.cont [7/16] %v356_v23, 128  ;;  %v861_v13 = vpop.trf.xlu1 }
 0x2d4   : > { %1102 = vst [vmem:[%s1649_s16 + $0x508] sm:$0xff] %v861_v13 }
 0x2d7   : > { %v831_v28 = vpop.trf.xlu0 }
 0x2d8   : > { %1074 = vst [vmem:[%s1649_s16 + $0x428] sm:$0xff] %v831_v28  ;;  %v894_v15 = vpop.trf.xlu2 }
 0x2d9   : > { %1136 = vst [vmem:[%s1649_s16 + $0x618] sm:$0xff] %v894_v15 }
 0x2db   : > { %916 = vxpose.xlu0.b32.cont [8/16] %v364_v29, 128  ;;  %v862_v16 = vpop.trf.xlu1 }
 0x2dc   : > { %1104 = vst [vmem:[%s1649_s16 + $0x518] sm:$0xff] %v862_v16 }
 0x2df   : > { %v832_v34 = vpop.trf.xlu0 }
 0x2e0   : > { %1076 = vst [vmem:[%s1649_s16 + $0x438] sm:$0xff] %v832_v34  ;;  %v895_v18 = vpop.trf.xlu2 }
 0x2e1   : > { %1138 = vst [vmem:[%s1649_s16 + $0x628] sm:$0xff] %v895_v18 }
 0x2e3   : > { %917 = vxpose.xlu0.b32.cont [9/16] %v372_v35, 128  ;;  %v863_v19 = vpop.trf.xlu1 }
 0x2e4   : > { %1106 = vst [vmem:[%s1649_s16 + $0x528] sm:$0xff] %v863_v19 }
 0x2e7   : > { %v833_v40 = vpop.trf.xlu0 }
 0x2e8   : > { %1078 = vst [vmem:[%s1649_s16 + $0x448] sm:$0xff] %v833_v40  ;;  %v896_v21 = vpop.trf.xlu2 }
 0x2e9   : > { %1140 = vst [vmem:[%s1649_s16 + $0x638] sm:$0xff] %v896_v21 }
 0x2eb   : > { %918 = vxpose.xlu0.b32.cont [10/16] %v380_v41, 128  ;;  %v864_v22 = vpop.trf.xlu1 }
 0x2ec   : > { %1108 = vst [vmem:[%s1649_s16 + $0x538] sm:$0xff] %v864_v22 }
 0x2ef   : > { %v834_v46 = vpop.trf.xlu0 }
 0x2f0   : > { %1080 = vst [vmem:[%s1649_s16 + $0x458] sm:$0xff] %v834_v46  ;;  %v897_v24 = vpop.trf.xlu2 }
 0x2f1   : > { %1142 = vst [vmem:[%s1649_s16 + $0x648] sm:$0xff] %v897_v24 }
 0x2f3   : > { %919 = vxpose.xlu0.b32.cont [11/16] %v388_v47, 128  ;;  %v865_v25 = vpop.trf.xlu1 }
 0x2f4   : > { %1110 = vst [vmem:[%s1649_s16 + $0x548] sm:$0xff] %v865_v25 }
 0x2f7   : > { %v835_v52 = vpop.trf.xlu0 }
 0x2f8   : > { %1082 = vst [vmem:[%s1649_s16 + $0x468] sm:$0xff] %v835_v52  ;;  %v898_v27 = vpop.trf.xlu2 }
 0x2f9   : > { %1144 = vst [vmem:[%s1649_s16 + $0x658] sm:$0xff] %v898_v27 }
 0x2fb   : > { %920 = vxpose.xlu0.b32.cont [12/16] %v396_v53, 128  ;;  %v866_v28 = vpop.trf.xlu1 }
 0x2fc   : > { %1112 = vst [vmem:[%s1649_s16 + $0x558] sm:$0xff] %v866_v28 }
 0x2ff   : > { %v836_v58 = vpop.trf.xlu0 }
 0x300   : > { %1084 = vst [vmem:[%s1649_s16 + $0x478] sm:$0xff] %v836_v58  ;;  %v899_v30 = vpop.trf.xlu2 }
 0x301   : > { %1146 = vst [vmem:[%s1649_s16 + $0x668] sm:$0xff] %v899_v30 }
 0x303   : > { %921 = vxpose.xlu0.b32.cont [13/16] %v404_v59, 128  ;;  %v867_v31 = vpop.trf.xlu1 }
 0x304   : > { %1114 = vst [vmem:[%s1649_s16 + $0x568] sm:$0xff] %v867_v31 }
 0x307   : > { %v837_v63 = vpop.trf.xlu0 }
 0x308   : > { %1086 = vst [vmem:[%s1649_s16 + $0x488] sm:$0xff] %v837_v63  ;;  %v900_v33 = vpop.trf.xlu2 }
 0x309   : > { %1148 = vst [vmem:[%s1649_s16 + $0x678] sm:$0xff] %v900_v33 }
 0x30b   : > { %922 = vxpose.xlu0.b32.cont [14/16] %v412_v0, 128  ;;  %v868_v34 = vpop.trf.xlu1 }
 0x30c   : > { %1116 = vst [vmem:[%s1649_s16 + $0x578] sm:$0xff] %v868_v34 }
 0x30f   : > { %v838_v3 = vpop.trf.xlu0 }
 0x310   : > { %1088 = vst [vmem:[%s1649_s16 + $0x498] sm:$0xff] %v838_v3  ;;  %v901_v36 = vpop.trf.xlu2 }
 0x311   : > { %1150 = vst [vmem:[%s1649_s16 + $0x688] sm:$0xff] %v901_v36 }
 0x313   : > { %923 = vxpose.xlu0.b32.cont [15/16] %v420_v4, 128  ;;  %v869_v37 = vpop.trf.xlu1 }
 0x314   : > { %1118 = vst [vmem:[%s1649_s16 + $0x588] sm:$0xff] %v869_v37 }
 0x317   : > { %v839_v7 = vpop.trf.xlu0 }
 0x318   : > { %1090 = vst [vmem:[%s1649_s16 + $0x4a8] sm:$0xff] %v839_v7  ;;  %v902_v39 = vpop.trf.xlu2 }
 0x319   : > { %1152 = vst [vmem:[%s1649_s16 + $0x698] sm:$0xff] %v902_v39 }
 0x31b   : > { %924 = vxpose.xlu0.b32.end [16/16] %v428_v8, 128  ;;  %v870_v40 = vpop.trf.xlu1 }
 0x31c   : > { %1120 = vst [vmem:[%s1649_s16 + $0x598] sm:$0xff] %v870_v40 }
 0x31f   : > { %v840_v11 = vpop.trf.xlu0 }
 0x320   : > { %1092 = vst [vmem:[%s1649_s16 + $0x4b8] sm:$0xff] %v840_v11  ;;  %v903_v42 = vpop.trf.xlu2 }
 0x321   : > { %1154 = vst [vmem:[%s1649_s16 + $0x6a8] sm:$0xff] %v903_v42 }
 0x323   : > { %v871_v43 = vpop.trf.xlu1 }
 0x324   : > { %1122 = vst [vmem:[%s1649_s16 + $0x5a8] sm:$0xff] %v871_v43 }
 0x327   : > { %v841_v14 = vpop.trf.xlu0 }
 0x328   : > { %1094 = vst [vmem:[%s1649_s16 + $0x4c8] sm:$0xff] %v841_v14  ;;  %v904_v45 = vpop.trf.xlu2 }
 0x329   : > { %1156 = vst [vmem:[%s1649_s16 + $0x6b8] sm:$0xff] %v904_v45 }
 0x32b   : > { %v872_v46 = vpop.trf.xlu1 }
 0x32c   : > { %1124 = vst [vmem:[%s1649_s16 + $0x5b8] sm:$0xff] %v872_v46 }
 0x32f   : > { %v842_v17 = vpop.trf.xlu0 }
 0x330   : > { %1096 = vst [vmem:[%s1649_s16 + $0x4d8] sm:$0xff] %v842_v17  ;;  %v905_v48 = vpop.trf.xlu2 }
 0x331   : > { %1158 = vst [vmem:[%s1649_s16 + $0x6c8] sm:$0xff] %v905_v48 }
 0x333   : > { %v873_v49 = vpop.trf.xlu1 }
 0x334   : > { %1126 = vst [vmem:[%s1649_s16 + $0x5c8] sm:$0xff] %v873_v49 }
 0x337   : > { %v843_v20 = vpop.trf.xlu0 }
 0x338   : > { %1098 = vst [vmem:[%s1649_s16 + $0x4e8] sm:$0xff] %v843_v20  ;;  %v906_v51 = vpop.trf.xlu2 }
 0x339   : > { %1160 = vst [vmem:[%s1649_s16 + $0x6d8] sm:$0xff] %v906_v51 }
 0x33b   : > { %v874_v52 = vpop.trf.xlu1 }
 0x33c   : > { %1128 = vst [vmem:[%s1649_s16 + $0x5d8] sm:$0xff] %v874_v52 }
 0x33f   : > { %v844_v23 = vpop.trf.xlu0 }
 0x340   : > { %1100 = vst [vmem:[%s1649_s16 + $0x4f8] sm:$0xff] %v844_v23  ;;  %v907_v54 = vpop.trf.xlu2 }
 0x341   : > { %1162 = vst [vmem:[%s1649_s16 + $0x6e8] sm:$0xff] %v907_v54 }
 0x343   : > { %v875_v55 = vpop.trf.xlu1 }
 0x344   : > { %1130 = vst [vmem:[%s1649_s16 + $0x5e8] sm:$0xff] %v875_v55 }
 0x347   : > { %v925_v26 = vpop.trf.xlu0 }
 0x348   : > { %1166 = vst [vmem:[%s1649_s16 + $0x708] sm:$0xff] %v925_v26  ;;  %v908_v57 = vpop.trf.xlu2 }
 0x349   : > { %1164 = vst [vmem:[%s1649_s16 + $0x6f8] sm:$0xff] %v908_v57 }
 0x34b   : > { %v876_v58 = vpop.trf.xlu1 }
 0x34c   : > { %1132 = vst [vmem:[%s1649_s16 + $0x5f8] sm:$0xff] %v876_v58 }
 0x34f   : > { %v926_v29 = vpop.trf.xlu0 }
 0x350   : > { %1168 = vst [vmem:[%s1649_s16 + $0x718] sm:$0xff] %v926_v29 }
 0x357   : > { %v927_v32 = vpop.trf.xlu0 }
 0x358   : > { %1170 = vst [vmem:[%s1649_s16 + $0x728] sm:$0xff] %v927_v32 }
 0x35f   : > { %v928_v35 = vpop.trf.xlu0 }
 0x360   : > { %1172 = vst [vmem:[%s1649_s16 + $0x738] sm:$0xff] %v928_v35 }
 0x367   : > { %v929_v38 = vpop.trf.xlu0 }
 0x368   : > { %1174 = vst [vmem:[%s1649_s16 + $0x748] sm:$0xff] %v929_v38 }
 0x36f   : > { %v930_v41 = vpop.trf.xlu0 }
 0x370   : > { %1176 = vst [vmem:[%s1649_s16 + $0x758] sm:$0xff] %v930_v41 }
 0x377   : > { %v931_v44 = vpop.trf.xlu0 }
 0x378   : > { %1178 = vst [vmem:[%s1649_s16 + $0x768] sm:$0xff] %v931_v44 }
 0x37f   : > { %v932_v47 = vpop.trf.xlu0 }
 0x380   : > { %1180 = vst [vmem:[%s1649_s16 + $0x778] sm:$0xff] %v932_v47 }
 0x387   : > { %v933_v50 = vpop.trf.xlu0 }
 0x388   : > { %1182 = vst [vmem:[%s1649_s16 + $0x788] sm:$0xff] %v933_v50 }
 0x38f   : > { %v934_v53 = vpop.trf.xlu0 }
 0x390   : > { %1184 = vst [vmem:[%s1649_s16 + $0x798] sm:$0xff] %v934_v53 }
 0x397   : > { %v935_v56 = vpop.trf.xlu0 }
 0x398   : > { %1186 = vst [vmem:[%s1649_s16 + $0x7a8] sm:$0xff] %v935_v56 }
 0x39f   : > { %v936_v59 = vpop.trf.xlu0 }
 0x3a0   : > { %1188 = vst [vmem:[%s1649_s16 + $0x7b8] sm:$0xff] %v936_v59 }
 0x3a7   : > { %v937_v60 = vpop.trf.xlu0 }
 0x3a8   : > { %1190 = vst [vmem:[%s1649_s16 + $0x7c8] sm:$0xff] %v937_v60 }
 0x3af   : > { %v938_v61 = vpop.trf.xlu0 }
 0x3b0   : > { %1192 = vst [vmem:[%s1649_s16 + $0x7d8] sm:$0xff] %v938_v61 }
 0x3b7   : > { %v939_v62 = vpop.trf.xlu0 }
 0x3b8   : > { %1194 = vst [vmem:[%s1649_s16 + $0x7e8] sm:$0xff] %v939_v62 }
 0x3bf   : > { %v940_v63 = vpop.trf.xlu0 }
 0x3c0   : > { %1196 = vst [vmem:[%s1649_s16 + $0x7f8] sm:$0xff] %v940_v63 }
 0x3c1   : > { %1452 = shalt.err (!%p1449_p13)
}
 0x3c2   : > { %s1511_s4 = smov 256   ;;  %s1512_s5 = smov 16  }
 0x3c3   : > { %1331 = dma.vmem_to_hbm [thread:$0]  (%p1574_p9), %s1216_s24, 32768, %s1218_s25, %s1198_s26, %s1511_s4, %s1511_s4, %s1512_s5  }
 0x3c4 PF: > { %s1232_s12 = sand.u32 1, %s1487_s6   ;;  %p1338_p0 = pnand %p1315_p12, %p1581_p11 }
 0x3c5   : > { %s1233_s13 = scalar_lea.sflag [#allocation4], %s1232_s12 }
 0x3c6   : > { %p1339_p1 = pneg %p1338_p0 }
 0x3c8   : > { %1482 = dma.done.wait (%p1339_p1), %s1233_s13, 32768  }
 0x3c9   : > { %1484 = vsyncadd (%p1339_p1), %s1233_s13, 4294934528  ;;  %s17_s11 = sadd.s32 1, %s1507_s11   ;;  %s2170_s6 = smov %s1491_s7 }
 0x3ca   : > { %p14_p2 = scmp.ge.s32.totalorder %s17_s11, 4   ;;  %s2171_s7 = smov %s1495_s8 }
 0x3cb   : > { %s2172_s8 = smov %s1579_s20  ;;  %s2173_s9 = smov %s1503_s10 }
 0x3cc   : > { %s2174_s10 = smov %s2176_s14  ;;  %16 = sbr.rel (!%p14_p2) target bundleno = 6 (0x6), region = 69 }
 0x3d1   :  { %1239 = vsyncpa [#allocation3], 1 }
 0x3d2   :  { %1241 = vsyncpa [#allocation3 + $0x1], 1 }
 0x3d3   :  { %1242 = vsyncpa [#allocation4], 1 }
 0x3d4   :  { %1244 = vsyncpa [#allocation4 + $0x1], 1 }

</bundles_post_ra>
